<compile_context>
chip_gen: v7x
topology: tpu7x:2x2x1
jax: 0.10.0
libtpu: 0.0.40
codegen_flags: <defaults>
</compile_context>

<pallas_src>
import functools

import numpy as np
import jax
import jax.numpy as jnp
from jax import lax
from jax.experimental import pallas as pl
from jax.experimental.pallas import tpu as pltpu


def _relu6(x):
    return jnp.minimum(jnp.maximum(x, 0.0), 6.0)


# --------------------------- fused MBConv kernel ------------------------------
def _mbconv_kernel(*refs, k, stride, w, hw, hwo, oup,
                   expand, has_se, add_identity):
    it = iter(refs)
    x_ref = next(it)                                   # (1, inp, HW)
    mask_ref = next(it)                                # (k*k, HW) {0,1} f32
    if expand:
        ew_ref, s0_ref, sh0_ref = next(it), next(it), next(it)
    dw_ref, s1_ref, sh1_ref = next(it), next(it), next(it)
    if stride > 1:
        sel_ref = next(it)                             # (HW, HWo) one-hot
    if has_se:
        wr_ref, br_ref, we_ref, be_ref = next(it), next(it), next(it), next(it)
    pw_ref, s2_ref, sh2_ref = next(it), next(it), next(it)
    o_ref = next(it)                                   # (1, final_oup, HWo)

    x2 = x_ref[0]                                      # (inp, HW) f32

    # -- 1x1 expand conv + BN0 + ReLU6 (bf16 MXU operands, f32 accumulate) --
    if expand:
        y = jnp.dot(ew_ref[...], x2.astype(jnp.bfloat16),
                    preferred_element_type=jnp.float32)         # (oup, HW)
        y = _relu6(y * s0_ref[...] + sh0_ref[...])
    else:
        y = x2                                                  # oup == inp

    # -- depthwise kxk: k*k shifted taps via pltpu.roll on the lane-major
    #    flattened spatial axis + precomputed edge masks (no padded scratch) --
    pad = (k - 1) // 2
    dww = dw_ref[...]                                  # (oup, k*k) f32
    msk = mask_ref[...]                                # (k*k, HW) f32
    acc = jnp.zeros((oup, hw), jnp.float32)
    for i in range(k):                                 # static unroll (k*k taps)
        for j in range(k):
            di, dj = i - pad, j - pad
            d = di * w + dj                            # flat-index offset of tap
            t = i * k + j
            # src[p] = y[p + d]  (invalid / wrapped positions masked to 0)
            src = y if d == 0 else pltpu.roll(y, shift=(-d) % hw, axis=1)
            acc = acc + (src * msk[t:t + 1, :]) * dww[:, t:t + 1]
    y = _relu6(acc * s1_ref[...] + sh1_ref[...])       # (oup, HW)

    # -- stride > 1: subsample flattened spatial positions with a one-hot
    #    selection matmul (keeps the lane-major layout) --
    if stride > 1:
        y = jnp.dot(y, sel_ref[...],
                    preferred_element_type=jnp.float32)         # (oup, HWo)

    # -- Squeeze-Excite as VPU/XLU reductions (csq is tiny; no 1-wide MXU dots)
    if has_se:
        pooled = jnp.sum(y, axis=1, keepdims=True) * (1.0 / float(hwo))  # (oup,1)
        t_se = jnp.sum(wr_ref[...] * pooled, axis=0, keepdims=True) + br_ref[...]
        t_se = _relu6(t_se)                                              # (1,csq)
        gate = jnp.sum(we_ref[...] * t_se, axis=1, keepdims=True) + be_ref[...]
        y = y * jax.nn.sigmoid(gate)                                     # (oup,HWo)

    # -- 1x1 project conv + BN2 (+ identity skip on the resident input) --
    z = jnp.dot(pw_ref[...], y.astype(jnp.bfloat16),
                preferred_element_type=jnp.float32)    # (final_oup, HWo)
    z = z * s2_ref[...] + sh2_ref[...]
    if add_identity:
        z = z + x2                                     # stride==1, inp==final_oup
    o_ref[0] = z


# ------------------------------- parameters -----------------------------------
def init_params(key, inp, final_oup, k, expand_ratio, se_ratio, has_se):
    oup = inp * expand_ratio
    keys = jax.random.split(key, 20)

    def bn(kg, kb, km, kv, c):
        return dict(
            gamma=jax.random.uniform(kg, (c,), jnp.float32, 0.8, 1.2),
            beta=jax.random.uniform(kb, (c,), jnp.float32, -0.1, 0.1),
            mean=jax.random.uniform(km, (c,), jnp.float32, -0.1, 0.1),
            var=jax.random.uniform(kv, (c,), jnp.float32, 0.5, 1.5),
        )

    p = {}
    if expand_ratio != 1:
        p["expand_w"] = 0.1 * jax.random.normal(keys[0], (inp, oup), jnp.float32)
        p["bn0"] = bn(keys[1], keys[2], keys[3], keys[4], oup)
    p["dw_w"] = 0.1 * jax.random.normal(keys[5], (k, k, oup), jnp.float32)
    p["bn1"] = bn(keys[6], keys[7], keys[8], keys[9], oup)
    if has_se:
        csq = max(1, int(inp * se_ratio))
        p["se_red_w"] = 0.1 * jax.random.normal(keys[10], (oup, csq), jnp.float32)
        p["se_red_b"] = 0.05 * jax.random.normal(keys[11], (1, csq), jnp.float32)
        p["se_exp_w"] = 0.1 * jax.random.normal(keys[12], (csq, oup), jnp.float32)
        p["se_exp_b"] = 0.05 * jax.random.normal(keys[13], (1, oup), jnp.float32)
    p["project_w"] = 0.1 * jax.random.normal(keys[14], (oup, final_oup), jnp.float32)
    p["bn2"] = bn(keys[15], keys[16], keys[17], keys[18], final_oup)
    return p


def _bn_fold(bn, eps):
    scale = bn["gamma"] / jnp.sqrt(bn["var"] + eps)
    shift = bn["beta"] - bn["mean"] * scale
    return scale, shift                                # 1-D (C,)


# ---------------------------- Pallas-backed forward ----------------------------
def mbconv_forward(x_nchw, params, *, inp, final_oup, k, s, expand_ratio,
                   se_ratio, has_se, eps=1e-3):
    B, C, H, W = x_nchw.shape
    assert C == inp
    oup = inp * expand_ratio
    expand = expand_ratio != 1
    pad = (k - 1) // 2
    ho = (H + 2 * pad - k) // s + 1
    wo = (W + 2 * pad - k) // s + 1
    hw, hwo = H * W, ho * wo
    add_identity = (s == 1 and inp == final_oup)       # id_skip=True in the module

    # NCHW -> (B, C, H*W): pure reshape, channels on sublanes, spatial on lanes.
    x_flat = x_nchw.reshape(B, inp, hw).astype(jnp.float32)

    s1, sh1 = _bn_fold(params["bn1"], eps)
    s2, sh2 = _bn_fold(params["bn2"], eps)

    # Precomputed {0,1} edge masks for the k*k shifted depthwise taps.
    pp = np.arange(hw)
    hh, ww = pp // W, pp % W
    masks = np.zeros((k * k, hw), np.float32)
    for i in range(k):
        for j in range(k):
            di, dj = i - pad, j - pad
            masks[i * k + j] = ((hh + di >= 0) & (hh + di < H) &
                                (ww + dj >= 0) & (ww + dj < W))

    def const(*shape):
        return pl.BlockSpec(shape, lambda b, _s=shape: (0,) * len(_s))

    args = [x_flat, jnp.asarray(masks)]
    in_specs = [pl.BlockSpec((1, inp, hw), lambda b: (b, 0, 0)),
                const(k * k, hw)]

    flops = 2 * B * hw * k * k * oup + 2 * B * hwo * oup * final_oup
    transc = 0

    if expand:
        s0, sh0 = _bn_fold(params["bn0"], eps)
        args += [params["expand_w"].T.astype(jnp.bfloat16),
                 s0.reshape(oup, 1), sh0.reshape(oup, 1)]
        in_specs += [const(oup, inp), const(oup, 1), const(oup, 1)]
        flops += 2 * B * hw * inp * oup

    args += [params["dw_w"].reshape(k * k, oup).T,        # (oup, k*k) f32
             s1.reshape(oup, 1), sh1.reshape(oup, 1)]
    in_specs += [const(oup, k * k), const(oup, 1), const(oup, 1)]

    if s > 1:                                             # one-hot spatial subsample
        sel = np.zeros((hw, hwo), np.float32)
        for oh in range(ho):
            for ow in range(wo):
                sel[(oh * s) * W + (ow * s), oh * wo + ow] = 1.0
        args += [jnp.asarray(sel)]
        in_specs += [const(hw, hwo)]

    if has_se:
        csq = params["se_red_w"].shape[1]
        args += [params["se_red_w"],                      # (oup, csq)
                 params["se_red_b"].reshape(1, csq),
                 params["se_exp_w"].T,                    # (oup, csq)
                 params["se_exp_b"].reshape(oup, 1)]
        in_specs += [const(oup, csq), const(1, csq),
                     const(oup, csq), const(oup, 1)]
        flops += 4 * B * oup * csq
        transc += B * oup

    args += [params["project_w"].T.astype(jnp.bfloat16),  # (final_oup, oup)
             s2.reshape(final_oup, 1), sh2.reshape(final_oup, 1)]
    in_specs += [const(final_oup, oup), const(final_oup, 1), const(final_oup, 1)]

    bytes_acc = (x_flat.size * 4 + B * final_oup * hwo * 4
                 + sum(int(a.size) * a.dtype.itemsize for a in args[1:]))

    kernel = functools.partial(
        _mbconv_kernel, k=k, stride=s, w=W, hw=hw, hwo=hwo, oup=oup,
        expand=expand, has_se=has_se, add_identity=add_identity)

    out_flat = pl.pallas_call(
        kernel,
        grid=(B,),
        in_specs=in_specs,
        out_specs=pl.BlockSpec((1, final_oup, hwo), lambda b: (b, 0, 0)),
        out_shape=jax.ShapeDtypeStruct((B, final_oup, hwo), jnp.float32),
        compiler_params=pltpu.CompilerParams(
            dimension_semantics=("parallel",)),
        cost_estimate=pl.CostEstimate(
            flops=int(flops), transcendentals=int(transc),
            bytes_accessed=int(bytes_acc)),
    )(*args)

    return out_flat.reshape(B, final_oup, ho, wo)         # NCHW, no transpose


# -------------------------- plain-JAX reference (check) ------------------------
def mbconv_reference(x_nchw, params, *, inp, final_oup, k, s, expand_ratio,
                     se_ratio, has_se, eps=1e-3):
    # Mirrors the kernel's bf16 MXU operands (quantize-then-f32) so the only
    # residual difference is f32 accumulation order.
    q = lambda t: t.astype(jnp.bfloat16).astype(jnp.float32)
    hi = lax.Precision.HIGHEST
    x = jnp.transpose(x_nchw, (0, 2, 3, 1)).astype(jnp.float32)
    identity = x
    oup = inp * expand_ratio
    if expand_ratio != 1:
        s0, sh0 = _bn_fold(params["bn0"], eps)
        x = _relu6(jnp.einsum("bhwc,cd->bhwd", q(x), q(params["expand_w"]),
                              precision=hi) * s0 + sh0)
    pad = (k - 1) // 2
    rhs = params["dw_w"][:, :, None, :]                    # HWIO, I=1
    y = lax.conv_general_dilated(
        x, rhs, window_strides=(s, s), padding=[(pad, pad), (pad, pad)],
        dimension_numbers=("NHWC", "HWIO", "NHWC"), feature_group_count=oup,
        precision=hi)
    s1, sh1 = _bn_fold(params["bn1"], eps)
    y = _relu6(y * s1 + sh1)
    if has_se:
        pooled = jnp.mean(y, axis=(1, 2))
        t = _relu6(jnp.einsum("bc,cq->bq", pooled, params["se_red_w"],
                              precision=hi) + params["se_red_b"])
        t = jnp.einsum("bq,qc->bc", t, params["se_exp_w"],
                       precision=hi) + params["se_exp_b"]
        y = y * jax.nn.sigmoid(t)[:, None, None, :]
    s2, sh2 = _bn_fold(params["bn2"], eps)
    z = jnp.einsum("bhwc,cd->bhwd", q(y), q(params["project_w"]),
                   precision=hi) * s2 + sh2
    if s == 1 and inp == final_oup:
        z = z + identity
    return jnp.transpose(z, (0, 3, 1, 2))


if __name__ == "__main__":
    # Block config: inp=4, final_oup=4, k=3, stride=1, expand_ratio=6,
    # se_ratio=0.25, has_se=True  -> identity skip path is active.
    cfg = dict(inp=4, final_oup=4, k=3, s=1, expand_ratio=6,
               se_ratio=0.25, has_se=True)

    key = jax.random.PRNGKey(0)
    kx, kp = jax.random.split(key)
    x = jax.random.normal(kx, (2, 4, 16, 16), jnp.float32)          # NCHW
    params = init_params(kp, cfg["inp"], cfg["final_oup"], cfg["k"],
                         cfg["expand_ratio"], cfg["se_ratio"], cfg["has_se"])

    out = mbconv_forward(x, params, **cfg)
    out = jax.block_until_ready(out)

    ref = jax.block_until_ready(mbconv_reference(x, params, **cfg))
    assert out.shape == (2, 4, 16, 16)
    # Both sides use identically bf16-quantized matmul operands with f32
    # accumulation; tolerance covers accumulation-order / EUP differences only.
    assert jnp.allclose(out, ref, atol=5e-4, rtol=5e-4), \
        f"max err {jnp.max(jnp.abs(out - ref))}"
    print("KERNEL_OK")
</pallas_src>

<mosaic_0001>
module attributes {stable_mosaic.version = 11 : i64} {
  func.func @_mbconv_kernel(%arg0: i32, %arg1: memref<1x4x256xf32, #tpu.memory_space<vmem>>, %arg2: memref<9x256xf32, #tpu.memory_space<vmem>>, %arg3: memref<24x4xbf16, #tpu.memory_space<vmem>>, %arg4: memref<24x1xf32, #tpu.memory_space<vmem>>, %arg5: memref<24x1xf32, #tpu.memory_space<vmem>>, %arg6: memref<24x9xf32, #tpu.memory_space<vmem>>, %arg7: memref<24x1xf32, #tpu.memory_space<vmem>>, %arg8: memref<24x1xf32, #tpu.memory_space<vmem>>, %arg9: memref<24x1xf32, #tpu.memory_space<vmem>>, %arg10: memref<1x1xf32, #tpu.memory_space<vmem>>, %arg11: memref<24x1xf32, #tpu.memory_space<vmem>>, %arg12: memref<24x1xf32, #tpu.memory_space<vmem>>, %arg13: memref<4x24xbf16, #tpu.memory_space<vmem>>, %arg14: memref<4x1xf32, #tpu.memory_space<vmem>>, %arg15: memref<4x1xf32, #tpu.memory_space<vmem>>, %arg16: memref<1x4x256xf32, #tpu.memory_space<vmem>>) attributes {dimension_semantics = [#tpu.dimension_semantics<parallel>], iteration_bounds = array<i64: 2>, scalar_prefetch = 0 : i64, scratch_operands = 0 : i64, tpu.core_type = #tpu.core_type<tc>, window_params = [{transform_indices = @transform_0, window_bounds = array<i64: 1, 4, 256>}, {pipeline_mode = #tpu.pipeline_mode<synchronous>, transform_indices = @transform_1, window_bounds = array<i64: 9, 256>}, {pipeline_mode = #tpu.pipeline_mode<synchronous>, transform_indices = @transform_2, window_bounds = array<i64: 24, 4>}, {pipeline_mode = #tpu.pipeline_mode<synchronous>, transform_indices = @transform_3, window_bounds = array<i64: 24, 1>}, {pipeline_mode = #tpu.pipeline_mode<synchronous>, transform_indices = @transform_4, window_bounds = array<i64: 24, 1>}, {pipeline_mode = #tpu.pipeline_mode<synchronous>, transform_indices = @transform_5, window_bounds = array<i64: 24, 9>}, {pipeline_mode = #tpu.pipeline_mode<synchronous>, transform_indices = @transform_6, window_bounds = array<i64: 24, 1>}, {pipeline_mode = #tpu.pipeline_mode<synchronous>, transform_indices = @transform_7, window_bounds = array<i64: 24, 1>}, {pipeline_mode = #tpu.pipeline_mode<synchronous>, transform_indices = @transform_8, window_bounds = array<i64: 24, 1>}, {pipeline_mode = #tpu.pipeline_mode<synchronous>, transform_indices = @transform_9, window_bounds = array<i64: 1, 1>}, {pipeline_mode = #tpu.pipeline_mode<synchronous>, transform_indices = @transform_10, window_bounds = array<i64: 24, 1>}, {pipeline_mode = #tpu.pipeline_mode<synchronous>, transform_indices = @transform_11, window_bounds = array<i64: 24, 1>}, {pipeline_mode = #tpu.pipeline_mode<synchronous>, transform_indices = @transform_12, window_bounds = array<i64: 4, 24>}, {pipeline_mode = #tpu.pipeline_mode<synchronous>, transform_indices = @transform_13, window_bounds = array<i64: 4, 1>}, {pipeline_mode = #tpu.pipeline_mode<synchronous>, transform_indices = @transform_14, window_bounds = array<i64: 4, 1>}, {transform_indices = @transform_15, window_bounds = array<i64: 1, 4, 256>}]} {
    %c0 = arith.constant 0 : index
    %c0_0 = arith.constant 0 : index
    %c0_1 = arith.constant 0 : index
    %0 = vector.load %arg1[%c0, %c0_0, %c0_1] : memref<1x4x256xf32, #tpu.memory_space<vmem>>, vector<1x4x256xf32>
    %1 = vector.shape_cast %0 : vector<1x4x256xf32> to vector<4x256xf32>
    %c0_2 = arith.constant 0 : index
    %c0_3 = arith.constant 0 : index
    %2 = vector.load %arg3[%c0_2, %c0_3] : memref<24x4xbf16, #tpu.memory_space<vmem>>, vector<24x4xbf16>
    %3 = arith.truncf %1 : vector<4x256xf32> to vector<4x256xbf16>
    %cst = arith.constant dense<0.000000e+00> : vector<24x256xf32>
    %4 = tpu.matmul %2, %3, %cst {dimension_numbers = #tpu.dot_dimension_numbers<[1], [0], [0], [1], [0, 0, 1, 1], [], []>} : vector<24x4xbf16>, vector<4x256xbf16>, vector<24x256xf32> -> vector<24x256xf32>
    %c0_4 = arith.constant 0 : index
    %c0_5 = arith.constant 0 : index
    %5 = vector.load %arg4[%c0_4, %c0_5] : memref<24x1xf32, #tpu.memory_space<vmem>>, vector<24x1xf32>
    %6 = vector.broadcast %5 : vector<24x1xf32> to vector<24x256xf32>
    %7 = arith.mulf %4, %6 : vector<24x256xf32>
    %c0_6 = arith.constant 0 : index
    %c0_7 = arith.constant 0 : index
    %8 = vector.load %arg5[%c0_6, %c0_7] : memref<24x1xf32, #tpu.memory_space<vmem>>, vector<24x1xf32>
    %9 = vector.broadcast %8 : vector<24x1xf32> to vector<24x256xf32>
    %10 = arith.addf %7, %9 : vector<24x256xf32>
    %cst_8 = arith.constant 0.000000e+00 : f32
    %11 = vector.broadcast %cst_8 : f32 to vector<24x256xf32>
    %12 = arith.maximumf %10, %11 : vector<24x256xf32>
    %cst_9 = arith.constant 6.000000e+00 : f32
    %13 = vector.broadcast %cst_9 : f32 to vector<24x256xf32>
    %14 = arith.minimumf %12, %13 : vector<24x256xf32>
    %c0_10 = arith.constant 0 : index
    %c0_11 = arith.constant 0 : index
    %15 = vector.load %arg6[%c0_10, %c0_11] : memref<24x9xf32, #tpu.memory_space<vmem>>, vector<24x9xf32>
    %c0_12 = arith.constant 0 : index
    %c0_13 = arith.constant 0 : index
    %16 = vector.load %arg2[%c0_12, %c0_13] : memref<9x256xf32, #tpu.memory_space<vmem>>, vector<9x256xf32>
    %cst_14 = arith.constant 0.000000e+00 : f32
    %17 = vector.broadcast %cst_14 : f32 to vector<24x256xf32>
    %c17_i32 = arith.constant 17 : i32
    %18 = tpu.dynamic_rotate %14 by %c17_i32 dim 1 : vector<24x256xf32>, i32 -> vector<24x256xf32>
    %19 = vector.extract_strided_slice %16 {offsets = [0, 0], sizes = [1, 256], strides = [1, 1]} : vector<9x256xf32> to vector<1x256xf32>
    %20 = vector.broadcast %19 : vector<1x256xf32> to vector<24x256xf32>
    %21 = arith.mulf %18, %20 : vector<24x256xf32>
    %22 = vector.extract_strided_slice %15 {offsets = [0, 0], sizes = [24, 1], strides = [1, 1]} : vector<24x9xf32> to vector<24x1xf32>
    %23 = vector.broadcast %22 : vector<24x1xf32> to vector<24x256xf32>
    %24 = arith.mulf %21, %23 : vector<24x256xf32>
    %25 = arith.addf %17, %24 : vector<24x256xf32>
    %c16_i32 = arith.constant 16 : i32
    %26 = tpu.dynamic_rotate %14 by %c16_i32 dim 1 : vector<24x256xf32>, i32 -> vector<24x256xf32>
    %27 = vector.extract_strided_slice %16 {offsets = [1, 0], sizes = [1, 256], strides = [1, 1]} : vector<9x256xf32> to vector<1x256xf32>
    %28 = vector.broadcast %27 : vector<1x256xf32> to vector<24x256xf32>
    %29 = arith.mulf %26, %28 : vector<24x256xf32>
    %30 = vector.extract_strided_slice %15 {offsets = [0, 1], sizes = [24, 1], strides = [1, 1]} : vector<24x9xf32> to vector<24x1xf32>
    %31 = vector.broadcast %30 : vector<24x1xf32> to vector<24x256xf32>
    %32 = arith.mulf %29, %31 : vector<24x256xf32>
    %33 = arith.addf %25, %32 : vector<24x256xf32>
    %c15_i32 = arith.constant 15 : i32
    %34 = tpu.dynamic_rotate %14 by %c15_i32 dim 1 : vector<24x256xf32>, i32 -> vector<24x256xf32>
    %35 = vector.extract_strided_slice %16 {offsets = [2, 0], sizes = [1, 256], strides = [1, 1]} : vector<9x256xf32> to vector<1x256xf32>
    %36 = vector.broadcast %35 : vector<1x256xf32> to vector<24x256xf32>
    %37 = arith.mulf %34, %36 : vector<24x256xf32>
    %38 = vector.extract_strided_slice %15 {offsets = [0, 2], sizes = [24, 1], strides = [1, 1]} : vector<24x9xf32> to vector<24x1xf32>
    %39 = vector.broadcast %38 : vector<24x1xf32> to vector<24x256xf32>
    %40 = arith.mulf %37, %39 : vector<24x256xf32>
    %41 = arith.addf %33, %40 : vector<24x256xf32>
    %c1_i32 = arith.constant 1 : i32
    %42 = tpu.dynamic_rotate %14 by %c1_i32 dim 1 : vector<24x256xf32>, i32 -> vector<24x256xf32>
    %43 = vector.extract_strided_slice %16 {offsets = [3, 0], sizes = [1, 256], strides = [1, 1]} : vector<9x256xf32> to vector<1x256xf32>
    %44 = vector.broadcast %43 : vector<1x256xf32> to vector<24x256xf32>
    %45 = arith.mulf %42, %44 : vector<24x256xf32>
    %46 = vector.extract_strided_slice %15 {offsets = [0, 3], sizes = [24, 1], strides = [1, 1]} : vector<24x9xf32> to vector<24x1xf32>
    %47 = vector.broadcast %46 : vector<24x1xf32> to vector<24x256xf32>
    %48 = arith.mulf %45, %47 : vector<24x256xf32>
    %49 = arith.addf %41, %48 : vector<24x256xf32>
    %50 = vector.extract_strided_slice %16 {offsets = [4, 0], sizes = [1, 256], strides = [1, 1]} : vector<9x256xf32> to vector<1x256xf32>
    %51 = vector.broadcast %50 : vector<1x256xf32> to vector<24x256xf32>
    %52 = arith.mulf %14, %51 : vector<24x256xf32>
    %53 = vector.extract_strided_slice %15 {offsets = [0, 4], sizes = [24, 1], strides = [1, 1]} : vector<24x9xf32> to vector<24x1xf32>
    %54 = vector.broadcast %53 : vector<24x1xf32> to vector<24x256xf32>
    %55 = arith.mulf %52, %54 : vector<24x256xf32>
    %56 = arith.addf %49, %55 : vector<24x256xf32>
    %c255_i32 = arith.constant 255 : i32
    %57 = tpu.dynamic_rotate %14 by %c255_i32 dim 1 : vector<24x256xf32>, i32 -> vector<24x256xf32>
    %58 = vector.extract_strided_slice %16 {offsets = [5, 0], sizes = [1, 256], strides = [1, 1]} : vector<9x256xf32> to vector<1x256xf32>
    %59 = vector.broadcast %58 : vector<1x256xf32> to vector<24x256xf32>
    %60 = arith.mulf %57, %59 : vector<24x256xf32>
    %61 = vector.extract_strided_slice %15 {offsets = [0, 5], sizes = [24, 1], strides = [1, 1]} : vector<24x9xf32> to vector<24x1xf32>
    %62 = vector.broadcast %61 : vector<24x1xf32> to vector<24x256xf32>
    %63 = arith.mulf %60, %62 : vector<24x256xf32>
    %64 = arith.addf %56, %63 : vector<24x256xf32>
    %c241_i32 = arith.constant 241 : i32
    %65 = tpu.dynamic_rotate %14 by %c241_i32 dim 1 : vector<24x256xf32>, i32 -> vector<24x256xf32>
    %66 = vector.extract_strided_slice %16 {offsets = [6, 0], sizes = [1, 256], strides = [1, 1]} : vector<9x256xf32> to vector<1x256xf32>
    %67 = vector.broadcast %66 : vector<1x256xf32> to vector<24x256xf32>
    %68 = arith.mulf %65, %67 : vector<24x256xf32>
    %69 = vector.extract_strided_slice %15 {offsets = [0, 6], sizes = [24, 1], strides = [1, 1]} : vector<24x9xf32> to vector<24x1xf32>
    %70 = vector.broadcast %69 : vector<24x1xf32> to vector<24x256xf32>
    %71 = arith.mulf %68, %70 : vector<24x256xf32>
    %72 = arith.addf %64, %71 : vector<24x256xf32>
    %c240_i32 = arith.constant 240 : i32
    %73 = tpu.dynamic_rotate %14 by %c240_i32 dim 1 : vector<24x256xf32>, i32 -> vector<24x256xf32>
    %74 = vector.extract_strided_slice %16 {offsets = [7, 0], sizes = [1, 256], strides = [1, 1]} : vector<9x256xf32> to vector<1x256xf32>
    %75 = vector.broadcast %74 : vector<1x256xf32> to vector<24x256xf32>
    %76 = arith.mulf %73, %75 : vector<24x256xf32>
    %77 = vector.extract_strided_slice %15 {offsets = [0, 7], sizes = [24, 1], strides = [1, 1]} : vector<24x9xf32> to vector<24x1xf32>
    %78 = vector.broadcast %77 : vector<24x1xf32> to vector<24x256xf32>
    %79 = arith.mulf %76, %78 : vector<24x256xf32>
    %80 = arith.addf %72, %79 : vector<24x256xf32>
    %c239_i32 = arith.constant 239 : i32
    %81 = tpu.dynamic_rotate %14 by %c239_i32 dim 1 : vector<24x256xf32>, i32 -> vector<24x256xf32>
    %82 = vector.extract_strided_slice %16 {offsets = [8, 0], sizes = [1, 256], strides = [1, 1]} : vector<9x256xf32> to vector<1x256xf32>
    %83 = vector.broadcast %82 : vector<1x256xf32> to vector<24x256xf32>
    %84 = arith.mulf %81, %83 : vector<24x256xf32>
    %85 = vector.extract_strided_slice %15 {offsets = [0, 8], sizes = [24, 1], strides = [1, 1]} : vector<24x9xf32> to vector<24x1xf32>
    %86 = vector.broadcast %85 : vector<24x1xf32> to vector<24x256xf32>
    %87 = arith.mulf %84, %86 : vector<24x256xf32>
    %88 = arith.addf %80, %87 : vector<24x256xf32>
    %c0_15 = arith.constant 0 : index
    %c0_16 = arith.constant 0 : index
    %89 = vector.load %arg7[%c0_15, %c0_16] : memref<24x1xf32, #tpu.memory_space<vmem>>, vector<24x1xf32>
    %90 = vector.broadcast %89 : vector<24x1xf32> to vector<24x256xf32>
    %91 = arith.mulf %88, %90 : vector<24x256xf32>
    %c0_17 = arith.constant 0 : index
    %c0_18 = arith.constant 0 : index
    %92 = vector.load %arg8[%c0_17, %c0_18] : memref<24x1xf32, #tpu.memory_space<vmem>>, vector<24x1xf32>
    %93 = vector.broadcast %92 : vector<24x1xf32> to vector<24x256xf32>
    %94 = arith.addf %91, %93 : vector<24x256xf32>
    %cst_19 = arith.constant 0.000000e+00 : f32
    %95 = vector.broadcast %cst_19 : f32 to vector<24x256xf32>
    %96 = arith.maximumf %94, %95 : vector<24x256xf32>
    %cst_20 = arith.constant 6.000000e+00 : f32
    %97 = vector.broadcast %cst_20 : f32 to vector<24x256xf32>
    %98 = arith.minimumf %96, %97 : vector<24x256xf32>
    %cst_21 = arith.constant dense<0.000000e+00> : vector<24xf32>
    %99 = vector.multi_reduction <add>, %98, %cst_21 [1] : vector<24x256xf32> to vector<24xf32>
    %100 = vector.shape_cast %99 : vector<24xf32> to vector<24x1xf32>
    %cst_22 = arith.constant 3.906250e-03 : f32
    %101 = vector.broadcast %cst_22 : f32 to vector<24x1xf32>
    %102 = arith.mulf %100, %101 : vector<24x1xf32>
    %c0_23 = arith.constant 0 : index
    %c0_24 = arith.constant 0 : index
    %103 = vector.load %arg9[%c0_23, %c0_24] : memref<24x1xf32, #tpu.memory_space<vmem>>, vector<24x1xf32>
    %104 = arith.mulf %103, %102 : vector<24x1xf32>
    %cst_25 = arith.constant dense<0.000000e+00> : vector<1xf32>
    %105 = vector.multi_reduction <add>, %104, %cst_25 [0] : vector<24x1xf32> to vector<1xf32>
    %106 = vector.shape_cast %105 : vector<1xf32> to vector<1x1xf32>
    %c0_26 = arith.constant 0 : index
    %c0_27 = arith.constant 0 : index
    %107 = vector.load %arg10[%c0_26, %c0_27] : memref<1x1xf32, #tpu.memory_space<vmem>>, vector<1x1xf32>
    %108 = arith.addf %106, %107 : vector<1x1xf32>
    %cst_28 = arith.constant 0.000000e+00 : f32
    %109 = vector.broadcast %cst_28 : f32 to vector<1x1xf32>
    %110 = arith.maximumf %108, %109 : vector<1x1xf32>
    %cst_29 = arith.constant 6.000000e+00 : f32
    %111 = vector.broadcast %cst_29 : f32 to vector<1x1xf32>
    %112 = arith.minimumf %110, %111 : vector<1x1xf32>
    %c0_30 = arith.constant 0 : index
    %c0_31 = arith.constant 0 : index
    %113 = vector.load %arg11[%c0_30, %c0_31] : memref<24x1xf32, #tpu.memory_space<vmem>>, vector<24x1xf32>
    %114 = vector.broadcast %112 : vector<1x1xf32> to vector<24x1xf32>
    %115 = arith.mulf %113, %114 : vector<24x1xf32>
    %cst_32 = arith.constant dense<0.000000e+00> : vector<24xf32>
    %116 = vector.multi_reduction <add>, %115, %cst_32 [1] : vector<24x1xf32> to vector<24xf32>
    %117 = vector.shape_cast %116 : vector<24xf32> to vector<24x1xf32>
    %c0_33 = arith.constant 0 : index
    %c0_34 = arith.constant 0 : index
    %118 = vector.load %arg12[%c0_33, %c0_34] : memref<24x1xf32, #tpu.memory_space<vmem>>, vector<24x1xf32>
    %119 = arith.addf %117, %118 : vector<24x1xf32>
    %120 = arith.negf %119 : vector<24x1xf32>
    %121 = math.exp %120 : vector<24x1xf32>
    %cst_35 = arith.constant 1.000000e+00 : f32
    %122 = vector.broadcast %cst_35 : f32 to vector<24x1xf32>
    %123 = arith.addf %122, %121 : vector<24x1xf32>
    %124 = arith.divf %122, %123 : vector<24x1xf32>
    %125 = vector.broadcast %124 : vector<24x1xf32> to vector<24x256xf32>
    %126 = arith.mulf %98, %125 : vector<24x256xf32>
    %c0_36 = arith.constant 0 : index
    %c0_37 = arith.constant 0 : index
    %127 = vector.load %arg13[%c0_36, %c0_37] : memref<4x24xbf16, #tpu.memory_space<vmem>>, vector<4x24xbf16>
    %128 = arith.truncf %126 : vector<24x256xf32> to vector<24x256xbf16>
    %cst_38 = arith.constant dense<0.000000e+00> : vector<4x256xf32>
    %129 = tpu.matmul %127, %128, %cst_38 {dimension_numbers = #tpu.dot_dimension_numbers<[1], [0], [0], [1], [0, 0, 1, 1], [], []>} : vector<4x24xbf16>, vector<24x256xbf16>, vector<4x256xf32> -> vector<4x256xf32>
    %c0_39 = arith.constant 0 : index
    %c0_40 = arith.constant 0 : index
    %130 = vector.load %arg14[%c0_39, %c0_40] : memref<4x1xf32, #tpu.memory_space<vmem>>, vector<4x1xf32>
    %131 = vector.broadcast %130 : vector<4x1xf32> to vector<4x256xf32>
    %132 = arith.mulf %129, %131 : vector<4x256xf32>
    %c0_41 = arith.constant 0 : index
    %c0_42 = arith.constant 0 : index
    %133 = vector.load %arg15[%c0_41, %c0_42] : memref<4x1xf32, #tpu.memory_space<vmem>>, vector<4x1xf32>
    %134 = vector.broadcast %133 : vector<4x1xf32> to vector<4x256xf32>
    %135 = arith.addf %132, %134 : vector<4x256xf32>
    %136 = arith.addf %135, %1 : vector<4x256xf32>
    %c0_43 = arith.constant 0 : index
    %c0_44 = arith.constant 0 : index
    %c0_45 = arith.constant 0 : index
    %137 = vector.load %arg16[%c0_43, %c0_44, %c0_45] : memref<1x4x256xf32, #tpu.memory_space<vmem>>, vector<1x4x256xf32>
    %138 = vector.shape_cast %137 : vector<1x4x256xf32> to vector<4x256xf32>
    %139 = vector.shape_cast %136 : vector<4x256xf32> to vector<1x4x256xf32>
    tpu.vector_store %arg16[%c0_43, %c0_44, %c0_45], %139 {strides = array<i32>} : memref<1x4x256xf32, #tpu.memory_space<vmem>>, vector<1x4x256xf32>,
    return
  }
  func.func @transform_0(%arg0: i32) -> (i32, i32, i32) {
    %c0_i32 = arith.constant 0 : i32
    %c0_i32_0 = arith.constant 0 : i32
    %c0_i32_1 = arith.constant 0 : i32
    return %arg0, %c0_i32, %c0_i32_0 : i32, i32, i32
  }
  func.func @transform_1(%arg0: i32) -> (i32, i32) {
    %c0_i32 = arith.constant 0 : i32
    %c0_i32_0 = arith.constant 0 : i32
    %c0_i32_1 = arith.constant 0 : i32
    return %c0_i32, %c0_i32_0 : i32, i32
  }
  func.func @transform_2(%arg0: i32) -> (i32, i32) {
    %c0_i32 = arith.constant 0 : i32
    %c0_i32_0 = arith.constant 0 : i32
    %c0_i32_1 = arith.constant 0 : i32
    return %c0_i32, %c0_i32_0 : i32, i32
  }
  func.func @transform_3(%arg0: i32) -> (i32, i32) {
    %c0_i32 = arith.constant 0 : i32
    %c0_i32_0 = arith.constant 0 : i32
    %c0_i32_1 = arith.constant 0 : i32
    return %c0_i32, %c0_i32_0 : i32, i32
  }
  func.func @transform_4(%arg0: i32) -> (i32, i32) {
    %c0_i32 = arith.constant 0 : i32
    %c0_i32_0 = arith.constant 0 : i32
    %c0_i32_1 = arith.constant 0 : i32
    return %c0_i32, %c0_i32_0 : i32, i32
  }
  func.func @transform_5(%arg0: i32) -> (i32, i32) {
    %c0_i32 = arith.constant 0 : i32
    %c0_i32_0 = arith.constant 0 : i32
    %c0_i32_1 = arith.constant 0 : i32
    return %c0_i32, %c0_i32_0 : i32, i32
  }
  func.func @transform_6(%arg0: i32) -> (i32, i32) {
    %c0_i32 = arith.constant 0 : i32
    %c0_i32_0 = arith.constant 0 : i32
    %c0_i32_1 = arith.constant 0 : i32
    return %c0_i32, %c0_i32_0 : i32, i32
  }
  func.func @transform_7(%arg0: i32) -> (i32, i32) {
    %c0_i32 = arith.constant 0 : i32
    %c0_i32_0 = arith.constant 0 : i32
    %c0_i32_1 = arith.constant 0 : i32
    return %c0_i32, %c0_i32_0 : i32, i32
  }
  func.func @transform_8(%arg0: i32) -> (i32, i32) {
    %c0_i32 = arith.constant 0 : i32
    %c0_i32_0 = arith.constant 0 : i32
    %c0_i32_1 = arith.constant 0 : i32
    return %c0_i32, %c0_i32_0 : i32, i32
  }
  func.func @transform_9(%arg0: i32) -> (i32, i32) {
    %c0_i32 = arith.constant 0 : i32
    %c0_i32_0 = arith.constant 0 : i32
    %c0_i32_1 = arith.constant 0 : i32
    return %c0_i32, %c0_i32_0 : i32, i32
  }
  func.func @transform_10(%arg0: i32) -> (i32, i32) {
    %c0_i32 = arith.constant 0 : i32
    %c0_i32_0 = arith.constant 0 : i32
    %c0_i32_1 = arith.constant 0 : i32
    return %c0_i32, %c0_i32_0 : i32, i32
  }
  func.func @transform_11(%arg0: i32) -> (i32, i32) {
    %c0_i32 = arith.constant 0 : i32
    %c0_i32_0 = arith.constant 0 : i32
    %c0_i32_1 = arith.constant 0 : i32
    return %c0_i32, %c0_i32_0 : i32, i32
  }
  func.func @transform_12(%arg0: i32) -> (i32, i32) {
    %c0_i32 = arith.constant 0 : i32
    %c0_i32_0 = arith.constant 0 : i32
    %c0_i32_1 = arith.constant 0 : i32
    return %c0_i32, %c0_i32_0 : i32, i32
  }
  func.func @transform_13(%arg0: i32) -> (i32, i32) {
    %c0_i32 = arith.constant 0 : i32
    %c0_i32_0 = arith.constant 0 : i32
    %c0_i32_1 = arith.constant 0 : i32
    return %c0_i32, %c0_i32_0 : i32, i32
  }
  func.func @transform_14(%arg0: i32) -> (i32, i32) {
    %c0_i32 = arith.constant 0 : i32
    %c0_i32_0 = arith.constant 0 : i32
    %c0_i32_1 = arith.constant 0 : i32
    return %c0_i32, %c0_i32_0 : i32, i32
  }
  func.func @transform_15(%arg0: i32) -> (i32, i32, i32) {
    %c0_i32 = arith.constant 0 : i32
    %c0_i32_0 = arith.constant 0 : i32
    %c0_i32_1 = arith.constant 0 : i32
    return %arg0, %c0_i32, %c0_i32_0 : i32, i32, i32
  }
}

</mosaic_0001>

<bundles_post_ra>
// kernel: tpu_custom_call.1
= control target key start
LH: loop header
LB: loop body
LE: loop exit
PB: predicated region body
PF: predicated region fallthrough
CT: control target
= control target key end

     0   :  { %s2481_s0 = inlined_call_operand.vmem [shape: f32[2,4,256], index: 0, kind: input, shape index: {}]   ;;  %s2482_s1 = inlined_call_operand.vmem [shape: f32[9,256], index: 1, kind: input, shape index: {}]   ;;  %s2483_s2 = inlined_call_operand.vmem [shape: bf16[24,4], index: 2, kind: input, shape index: {}]   ;;  %s2484_s3 = inlined_call_operand.vmem [shape: f32[24,1], index: 3, kind: input, shape index: {}]   ;;  %s2485_s4 = inlined_call_operand.vmem [shape: f32[24,1], index: 4, kind: input, shape index: {}]   ;;  %s2486_s5 = inlined_call_operand.vmem [shape: f32[24,9], index: 5, kind: input, shape index: {}]   ;;  %s2487_s6 = inlined_call_operand.vmem [shape: f32[24,1], index: 6, kind: input, shape index: {}]   ;;  %s2488_s7 = inlined_call_operand.vmem [shape: f32[24,1], index: 7, kind: input, shape index: {}]   ;;  %s2489_s8 = inlined_call_operand.vmem [shape: f32[24,1], index: 8, kind: input, shape index: {}]   ;;  %s2490_s9 = inlined_call_operand.<no memory space> [shape: f32[1,1], index: 9, kind: input, shape index: {}]   ;;  %s2491_s10 = inlined_call_operand.vmem [shape: f32[24,1], index: 10, kind: input, shape index: {}]   ;;  %s2492_s11 = inlined_call_operand.vmem [shape: f32[24,1], index: 11, kind: input, shape index: {}]   ;;  %s2493_s12 = inlined_call_operand.vmem [shape: bf16[4,24], index: 12, kind: input, shape index: {}]   ;;  %s2494_s13 = inlined_call_operand.vmem [shape: f32[4,1], index: 13, kind: input, shape index: {}]   ;;  %s2495_s14 = inlined_call_operand.vmem [shape: f32[4,1], index: 14, kind: input, shape index: {}]   ;;  %s2496_s15 = inlined_call_operand.hbm [shape: f32[2,4,256], index: 15, kind: output, shape index: {}]  }
   0x1   :  { %v20_v0 = vstv %s2490_s9 }
   0x2   :  { %21 = vst [vmem:[#allocation2] sm:$0x1] %v20_v0 }
   0x3   :  { %22 = vsyncpa [#allocation4], 0 }
   0x4   :  { %24 = vsyncpa [#allocation4 + $0x1], 0  ;;  %s1734_s20 = smov 0   ;;  %s1736_s21 = smov 0  }
   0x5   :  { %s1738_s22 = smov 0   ;;  %s1740_s23 = smov 0  }
   0x6 LB: > { %2517 = sst [smem:[#allocation6_spill]] %s1627_s22  ;;  %s1755_s9 = sadd.s32 4294967295, %s1631_s23   ;;  %s1631_s23 = sphi %s1740_s23, %s2553_s23   ;;  %s1627_s22 = sphi %s1738_s22, %s2555_s22   ;;  %s1623_s21 = sphi %s1736_s21, %s2557_s21   ;;  %s1619_s20 = sphi %s1734_s20, %s2556_s20  }
   0x7   : > { %s1450_s24 = sadd.s32 4294967294, %s1631_s23   ;;  %s1759_s25 = sadd.s32 1, %s1631_s23  }
   0x8   : > { %2518 = sst [smem:[#allocation7_spill]] %s1759_s25  ;;  %s357_s26 = sadd.s32 1, %s1627_s22 }
   0x9   : > { %s354_s27 = ssub.s32 %s1631_s23, %s1759_s25  ;;  %p367_p0 = scmp.ne.s32.totalorder %s1627_s22, %s1623_s21 }
   0xa   : > { %p355_p1 = scmp.eq.s32.totalorder %s354_s27, 0  ;;  %p368_p2 = scmp.eq.s32.totalorder %s1755_s9, 1 }
   0xb   : > { %p373_p3 = scmp.ne.s32.totalorder %s1623_s21, %s1619_s20  ;;  %p374_p4 = scmp.eq.s32.totalorder %s1450_s24, 1 }
   0xc   : > { %s1770_s28 = scalar_select %p355_p1, %s1627_s22, %s357_s26  }
   0xd   : > { %p1772_p5 = por %p368_p2, %p367_p0  ;;  %p1776_p6 = por %p374_p4, %p373_p3 }
   0xe   : > { %2519 = sst [smem:[#allocation8_spill]] %s1770_s28  ;;  %p1453_p7 = scmp.ge.s32.totalorder %s1631_s23, 1 }
   0xf   : > { %s2521_s30 = scalar_select %p1776_p6, 1, 0 }
  0x10   : > { %p442_p8 = scmp.lt.s32.totalorder %s1631_s23, 3 }
  0x11   : > { %2522 = sst [smem:[#allocation9_spill]] %s2521_s30 }
  0x12   : > { %p443_p9 = pnand %p1453_p7, %p442_p8 }
  0x14   : > { %446 = sbr.rel (%p443_p9) target bundleno = 1110 (0x456), region = 80 }
  0x1b   : > { %p490_p10 = scmp.lt.s32.totalorder %s1755_s9, 1  ;;  %v1633_v1 = vmov 0   ;;  %v578_v2 = vld [vmem:[%s2484_s3] sm:$0xff]  ;;  %v580_v3 = vld [vmem:[%s2484_s3 + $0x10] sm:$0xff]  ;;  %v579_v4 = vld [vmem:[%s2484_s3 + $0x8] sm:$0xff]  ;;  %vm520_vm0 = vcmask 1041408   ;;  %v657_v39 = vlaneseq }
  0x1c   : > { %559 = vmatprep.mubr.bf16.mxu0 %v1633_v1  ;;  %1532 = vset.pattern.permute.xlu0 %v1633_v1  ;;  %v602_v5 = vld [vmem:[%s2485_s4] sm:$0xff]  ;;  %v603_v9 = vld [vmem:[%s2485_s4 + $0x8] sm:$0xff]  ;;  %v604_v10 = vld [vmem:[%s2485_s4 + $0x10] sm:$0xff]  ;;  %vm513_vm1 = vcmask 31744   ;;  %v1634_v16 = vmov 1   ;;  %v1635_v19 = vmov 2  }
  0x1d   : > { %s491_s18 = scalar_select %p490_p10, %s1755_s9, 1  ;;  %1533 = vset.pattern.permute.xlu1 %v1633_v1  ;;  %583 = vperm.xlu0 %1532, %v578_v2   ;;  %v1554_v13 = vld [vmem:[%s2483_s2] sm:$0xff]   ;;  %v639_v14 = vld [vmem:[%s2486_s5 + $0x8] sm:$0xff]  ;;  %v640_v17 = vld [vmem:[%s2486_s5 + $0x10] sm:$0xff]  ;;  %v1636_v20 = vmov 3   ;;  %v1637_v21 = vmov 4  }
  0x1e   : > { %593 = vperm.xlu1 %1533, %v580_v3   ;;  %1344 = vmatprep.mubr.bf16.mxu1 %v1633_v1  ;;  %v638_v15 = vld [vmem:[%s2486_s5] sm:$0xff]  ;;  %v1555_v18 = vld [vmem:[%s2483_s2 + $0x8] ss:$0 sps:$4 sm:$0xff]   ;;  %v1638_v22 = vmov 5   ;;  %v1639_v23 = vmov 6   ;;  %v1640_v24 = vmov 7  }
  0x1f   : > { %s1474_s28 = sshll.u32 %s491_s18, 3  ;;  %v1641_v25 = vmov 8   ;;  %v1144_v26 = vld [vmem:[%s2487_s6] sm:$0xff]  ;;  %v1859_v42 = vshrl.u32 %v657_v39, 7  ;;  %v1874_v54 = vld [vmem:[%s2482_s1 + $0x8] sm:$0xff]  ;;  %s2505_s19 = smov 16  }
  0x20   : > { %s1803_s30 = scalar_lea.vmem %s2481_s0, %s1474_s28  ;;  %v1869_v51 = vld [vmem:[%s2482_s1] sm:$0xff]  ;;  %s2503_s24 = smov 17   ;;  %vm1222_vm10 = vcmask 7168   ;;  %vm1305_vm11 = vcmask 1043456   ;;  %vm1301_vm12 = vcmask 195584  }
  0x21   : > { %v496_v6 = vld [vmem:[%s1803_s30] sm:$0xff]  ;;  %588 = vperm.xlu0 %1532, %v579_v4   ;;  %v880_v47 = vsub.s32 4, %v1859_v42  ;;  %s1644_s18 = smov 15   ;;  %s1645_s22 = smov 127  }
  0x22   : > { %v1806_v7 = vcombine.high %v496_v6, %v496_v6  ;;  %v503_v8 = vpack.c.bf16 %v496_v6, %v496_v6  ;;  %607 = vperm.xlu1 %1533, %v602_v5   ;;  %s1646_s25 = smov 1   ;;  %s2501_s28 = smov 111  }
  0x23   : > { %v1877_v57 = vrot.slane %v1869_v51, %v880_v47  ;;  %v1882_v60 = vrot.slane %v1874_v54, %v880_v47  ;;  %s1648_s26 = smov 113   ;;  %s1649_s27 = smov 112  }
  0x24   : > { %2523 = vst [vmem:[#allocation10_spill] sm:$0xff] %v1806_v7  ;;  %v504_v11 = vpack.c.bf16 %v1806_v7, %v1806_v7  ;;  %v522_v12 = vsel %vm520_vm0, %v503_v8, 0  ;;  %s2535_s16 = smov 111   ;;  %s2537_s17 = smov 16  }
  0x25   : > { %612 = vperm.xlu0 %1532, %v603_v9  }
  0x26   : > { %1459 = vmatprep.subr.msk.bf16.mxu0 %vm520_vm0, %v504_v11  ;;  %617 = vperm.xlu1 %1533, %v604_v10  }
  0x27   : > { %528 = vmatpush1.bf16.msra.mxu0 %v522_v12 }
  0x29   : > { %1534 = vset.pattern.permute.xlu0 %v1634_v16 }
  0x2a   : > { %1460 = vmatmul.mubr.msk.bf16.vlgmr.msra.gmra.mrb[0].mxu0 %vm513_vm1, %v1554_v13  ;;  %687 = vperm.xlu1 %1533, %v639_v14  }
  0x2b   : > { %569 = vmatprep.mubr.bf16.mxu0 %v1633_v1  ;;  %741 = vperm.xlu0 %1534, %v638_v15  }
  0x2e   : > { %1535 = vset.pattern.permute.xlu1 %v1634_v16 }
  0x2f   : > { %749 = vperm.xlu0 %1534, %v640_v17   ;;  %745 = vperm.xlu1 %1535, %v639_v14  }
  0x32   : > { %1461 = vmatmul.mubr.msk.bf16.gmra.mrb[4].mxu0 %vm513_vm1, %v1555_v18 }
  0x33   : > { %1538 = vset.pattern.permute.xlu0 %v1635_v19  ;;  %1536 = vset.pattern.permute.xlu1 %v1633_v1 }
  0x34   : > { %802 = vperm.xlu0 %1538, %v639_v14   ;;  %692 = vperm.xlu1 %1536, %v640_v17  }
  0x38   : > { %806 = vperm.xlu0 %1538, %v640_v17   ;;  %1537 = vset.pattern.permute.xlu1 %v1635_v19 }
  0x39   : > { %798 = vperm.xlu1 %1537, %v638_v15  }
  0x3c   : > { %1540 = vset.pattern.permute.xlu0 %v1636_v20 }
  0x3d   : > { %859 = vperm.xlu0 %1540, %v639_v14   ;;  %1539 = vset.pattern.permute.xlu1 %v1636_v20 }
  0x3e   : > { %855 = vperm.xlu1 %1539, %v638_v15  }
  0x41   : > { %863 = vperm.xlu0 %1540, %v640_v17  }
  0x42   : > { %1541 = vset.pattern.permute.xlu1 %v1637_v21 }
  0x43   : > { %893 = vperm.xlu1 %1541, %v638_v15  }
  0x45   : > { %1542 = vset.pattern.permute.xlu0 %v1637_v21 }
  0x46   : > { %897 = vperm.xlu0 %1542, %v639_v14  }
  0x47   : > { %1543 = vset.pattern.permute.xlu1 %v1638_v22 }
  0x48   : > { %950 = vperm.xlu1 %1543, %v638_v15  }
  0x4a   : > { %901 = vperm.xlu0 %1542, %v640_v17  }
  0x4c   : > { %1545 = vset.pattern.permute.xlu1 %v1639_v23 }
  0x4d   : > { %1007 = vperm.xlu1 %1545, %v638_v15  }
  0x4e   : > { %1544 = vset.pattern.permute.xlu0 %v1638_v22 }
  0x4f   : > { %954 = vperm.xlu0 %1544, %v639_v14  }
  0x51   : > { %1547 = vset.pattern.permute.xlu1 %v1640_v24 }
  0x52   : > { %1064 = vperm.xlu1 %1547, %v638_v15  }
  0x53   : > { %958 = vperm.xlu0 %1544, %v640_v17  }
  0x56   : > { %1549 = vset.pattern.permute.xlu1 %v1641_v25 }
  0x57   : > { %1546 = vset.pattern.permute.xlu0 %v1639_v23  ;;  %1121 = vperm.xlu1 %1549, %v638_v15  }
  0x58   : > { %1011 = vperm.xlu0 %1546, %v639_v14  }
  0x5b   : > { %1552 = vset.pattern.permute.xlu1 %v1633_v1 }
  0x5c   : > { %1015 = vperm.xlu0 %1546, %v640_v17   ;;  %1149 = vperm.xlu1 %1552, %v1144_v26  }
  0x60   : > { %1548 = vset.pattern.permute.xlu0 %v1640_v24 }
  0x61   : > { %1068 = vperm.xlu0 %1548, %v639_v14  }
  0x65   : > { %1072 = vperm.xlu0 %1548, %v640_v17  }
  0x69   : > { %1550 = vset.pattern.permute.xlu0 %v1641_v25 }
  0x6a   : > { %1125 = vperm.xlu0 %1550, %v639_v14  }
  0x6e   : > { %1129 = vperm.xlu0 %1550, %v640_v17  }
  0x72   : > { %1551 = vset.pattern.permute.xlu0 %v1633_v1 }
  0x73   : > { %682 = vperm.xlu0 %1551, %v638_v15  }
  0x9c   : > { %v584_v27 = vpop.permute.xlu0 %583 }
  0x9d   : > { %v594_v28 = vpop.permute.xlu1 %593 }
  0xa0   : > { %v1838_v29 = vpop.permute.xlu0 %588 }
  0xa1   : > { %v608_v30 = vpop.permute.xlu1 %607 }
  0xa4   : > { %v1840_v31 = vpop.permute.xlu0 %612 }
  0xa5   : > { %v618_v32 = vpop.permute.xlu1 %617 }
  0xa9   : > { %v1844_v34 = vpop.permute.xlu1 %687 }
  0xaa   : > { %v1842_v33 = vpop.permute.xlu0 %741 }
  0xae   : > { %v1846_v35 = vpop.permute.xlu0 %749  ;;  %v1848_v36 = vpop.permute.xlu1 %745 }
  0xaf   : > { %2524 = vst [vmem:[#allocation11_spill] sm:$0xff] %v1846_v35 }
  0xb3   : > { %v1850_v37 = vpop.permute.xlu0 %802  ;;  %v1852_v38 = vpop.permute.xlu1 %692 }
  0xb4   : > { %2525 = vst [vmem:[#allocation12_spill] sm:$0xff] %v1852_v38 }
  0xb7   : > { %v1854_v40 = vpop.permute.xlu0 %806 }
  0xb8   : > { %2526 = vst [vmem:[#allocation13_spill] sm:$0xff] %v1854_v40  ;;  %v1856_v41 = vpop.permute.xlu1 %798 }
  0xbc   : > { %v1861_v44 = vpop.permute.xlu0 %859 }
  0xbd   : > { %v1864_v50 = vpop.permute.xlu1 %855 }
  0xc0   : > { %v1879_v59 = vpop.permute.xlu0 %863 }
  0xc1   : > { %2527 = vst [vmem:[#allocation14_spill] sm:$0xff] %v1879_v59 }
  0xc2   : > { %v894_v0 = vpop.permute.xlu1 %893 }
  0xc5   : > { %v1893_v14 = vpop.permute.xlu0 %897 }
  0xc9   : > { %v902_v20 = vpop.permute.xlu0 %901 }
  0xfd   : > { %v561_v43 = vpop.f32.mrb[0].mxu0 }
  0xfe   : > { %v596_v45 = vmul.f32 %v584_v27, %v561_v43  ;;  %v563_v46 = vpop.f32.mrb[1].mxu0  ;;  %v1146_v43 = vld [vmem:[%s2487_s6 + $0x10] sm:$0xff] }
  0xff   : > { %v597_v48 = vmul.f32 %v584_v27, %v563_v46  ;;  %v565_v49 = vpop.f32.mrb[2].mxu0  ;;  %v1169_v46 = vld [vmem:[%s2488_s7 + $0x8] sm:$0xff] }
 0x100   : > { %v620_v52 = vadd.f32 %v608_v30, %v596_v45  ;;  %v567_v53 = vpop.f32.mrb[3].mxu0  ;;  %v598_v8 = vmul.f32 %v1838_v29, %v565_v49 }
 0x101   : > { %v621_v55 = vadd.f32 %v608_v30, %v597_v48  ;;  %v599_v27 = vmul.f32 %v1838_v29, %v567_v53  ;;  %v1145_v29 = vld [vmem:[%s2487_s6 + $0x8] sm:$0xff]  ;;  %v1168_v48 = vld [vmem:[%s2488_s7] sm:$0xff] }
 0x102   : > { %v626_v56 = vmax.f32 %v620_v52, 0.0  ;;  %v622_v17 = vadd.f32 %v1840_v31, %v598_v8  ;;  %v1990_v52 = vpop.permute.xlu1 %950 }
 0x103   : > { %v627_v58 = vmax.f32 %v621_v55, 0.0 }
 0x104   : > { %v632_v61 = vmin.f32 %v626_v56, 6.0  ;;  %v628_v23 = vmax.f32 %v622_v17, 0.0  ;;  %v728_v17 = vsub.s32 1, %v1859_v42 }
 0x105   : > { %v633_v62 = vmin.f32 %v627_v58, 6.0  ;;  %v571_v63 = vpop.f32.mrb[4].mxu0 }
 0x106   : > { %v600_v1 = vmul.f32 %v594_v28, %v571_v63  ;;  %707 = vrot.lane.b32.xlu0 %v632_v61, %s2505_s19  ;;  %645 = vrot.lane.b32.xlu1 %v632_v61, %s2503_s24  ;;  %v573_v2 = vpop.f32.mrb[5].mxu0  ;;  %v886_v3 = vmul.f32 %v1877_v57, %v632_v61  ;;  %v1914_v26 = vmin.f32 %v628_v23, 6.0  ;;  %v1996_v55 = vpop.permute.xlu1 %1007  ;;  %v2060_v23 = vrot.slane %v1874_v54, %v728_v17 }
 0x107   : > { %v601_v4 = vmul.f32 %v594_v28, %v573_v2  ;;  %v887_v5 = vmul.f32 %v1882_v60, %v633_v62  ;;  %v575_v6 = vpop.f32.mrb[6].mxu0  ;;  %v623_v28 = vadd.f32 %v1840_v31, %v599_v27  ;;  %v1961_v31 = vpop.permute.xlu0 %954  ;;  %v785_v27 = vsub.s32 2, %v1859_v42 }
 0x108   : > { %v624_v9 = vadd.f32 %v618_v32, %v600_v1  ;;  %v1889_v10 = vmul.f32 %v894_v0, %v886_v3  ;;  %v576_v11 = vpop.f32.mrb[7].mxu0 }
 0x109   : > { %v625_v12 = vadd.f32 %v618_v32, %v601_v4  ;;  %v1891_v13 = vmul.f32 %v894_v0, %v887_v5  ;;  %v629_v30 = vmax.f32 %v623_v28, 0.0 }
 0x10a   : > { %v630_v15 = vmax.f32 %v624_v9, 0.0  ;;  %764 = vrot.lane.b32.xlu0 %v632_v61, %s1644_s18  ;;  %916 = vrot.lane.b32.xlu1 %v632_v61, %s1645_s22  ;;  %v2004_v58 = vpop.permute.xlu1 %1064 }
 0x10b   : > { %v631_v16 = vmax.f32 %v625_v12, 0.0  ;;  %v1939_v32 = vmin.f32 %v629_v30, 6.0  ;;  %v1968_v45 = vpop.permute.xlu0 %958  ;;  %v1170_v12 = vld [vmem:[%s2488_s7 + $0x10] sm:$0xff] }
 0x10c   : > { %v1898_v18 = vmin.f32 %v630_v15, 6.0  ;;  %2530 = vst [vmem:[#allocation17_spill] sm:$0xff] %v1968_v45 }
 0x10d   : > { %v1900_v19 = vmin.f32 %v631_v16, 6.0 }
 0x10e   : > { %821 = vrot.lane.b32.xlu0 %v632_v61, %s1646_s25  ;;  %1087 = vrot.lane.b32.xlu1 %v632_v61, %s2501_s28  ;;  %v890_v21 = vmul.f32 %v1877_v57, %v1898_v18 }
 0x10f   : > { %v891_v22 = vmul.f32 %v1882_v60, %v1900_v19  ;;  %v1979_v47 = vpop.permute.xlu0 %1011 }
 0x110   : > { %v1908_v24 = vmul.f32 %v902_v20, %v890_v21 }
 0x111   : > { %v1910_v25 = vmul.f32 %v902_v20, %v891_v22  ;;  %v2050_v20 = vsub.s32 0, %v1859_v42 }
 0x112   : > { %2528 = vst [vmem:[#allocation15_spill] sm:$0xff] %v1908_v24  ;;  %973 = vrot.lane.b32.xlu0 %v632_v61, %s1648_s26  ;;  %1093 = vrot.lane.b32.xlu1 %v633_v62, %s2501_s28 }
 0x113   : > { %2529 = vst [vmem:[#allocation16_spill] sm:$0xff] %v1910_v25  ;;  %v1984_v49 = vpop.permute.xlu0 %1015  ;;  %2538 = vst [vmem:[#allocation22_spill] sm:$0xff] %v2050_v20  ;;  %v2069_v28 = vrot.slane %v1874_v54, %v2050_v20 }
 0x114   : > { %2532 = vst [vmem:[#allocation18_spill] sm:$0xff] %v1984_v49  ;;  %v937_v49 = vsub.s32 5, %v1859_v42 }
 0x116   : > { %1030 = vrot.lane.b32.xlu0 %v632_v61, %s1649_s27  ;;  %647 = vrot.lane.b32.xlu1 %v1914_v26, %s2503_s24  ;;  %v2113_v59 = vrot.slane %v1869_v51, %v937_v49 }
 0x117   : > { %v1992_v53 = vpop.permute.xlu0 %1068 }
 0x11a   : > { %651 = vrot.lane.b32.xlu0 %v633_v62, %s2503_s24  ;;  %709 = vrot.lane.b32.xlu1 %v1914_v26, %s2505_s19 }
 0x11b   : > { %v1998_v56 = vpop.permute.xlu0 %1072 }
 0x11c   : > { %2533 = vst [vmem:[#allocation19_spill] sm:$0xff] %v1998_v56  ;;  %v2089_v56 = vrot.slane %v1874_v54, %v785_v27 }
 0x11e   : > { %713 = vrot.lane.b32.xlu0 %v633_v62, %s2505_s19  ;;  %766 = vrot.lane.b32.xlu1 %v1914_v26, %s1644_s18 }
 0x11f   : > { %v2006_v61 = vpop.permute.xlu0 %1125 }
 0x120   : > { %2534 = vst [vmem:[#allocation20_spill] sm:$0xff] %v2006_v61 }
 0x122   : > { %770 = vrot.lane.b32.xlu0 %v633_v62, %s1644_s18  ;;  %823 = vrot.lane.b32.xlu1 %v1914_v26, %s1646_s25 }
 0x123   : > { %v2012_v63 = vpop.permute.xlu0 %1129 }
 0x124   : > { %2536 = vst [vmem:[#allocation21_spill] sm:$0xff] %v2012_v63  ;;  %v2086_v63 = vrot.slane %v1869_v51, %v785_v27 }
 0x126   : > { %827 = vrot.lane.b32.xlu0 %v633_v62, %s1646_s25  ;;  %918 = vrot.lane.b32.xlu1 %v1914_v26, %s1645_s22 }
 0x127   : > { %v683_v1 = vpop.permute.xlu0 %682 }
 0x12a   : > { %922 = vrot.lane.b32.xlu0 %v633_v62, %s1645_s22  ;;  %975 = vrot.lane.b32.xlu1 %v1914_v26, %s1648_s26 }
 0x12e   : > { %979 = vrot.lane.b32.xlu0 %v633_v62, %s1648_s26  ;;  %1032 = vrot.lane.b32.xlu1 %v1914_v26, %s1649_s27 }
 0x132   : > { %1036 = vrot.lane.b32.xlu0 %v633_v62, %s1649_s27  ;;  %653 = vrot.lane.b32.xlu1 %v1939_v32, %s2503_s24  ;;  %v2010_v62 = vpop.permute.xlu1 %1121 }
 0x136   : > { %1089 = vrot.lane.b32.xlu0 %v1914_v26, %s2501_s28  ;;  %715 = vrot.lane.b32.xlu1 %v1939_v32, %s2505_s19  ;;  %v2018_v0 = vpop.permute.xlu1 %1149 }
 0x13a   : > { %1095 = vrot.lane.b32.xlu0 %v1939_v32, %s2501_s28  ;;  %772 = vrot.lane.b32.xlu1 %v1939_v32, %s1644_s18 }
 0x13e   : > { %829 = vrot.lane.b32.xlu1 %v1939_v32, %s1646_s25  ;;  %711 = vrot.lane.b32.xlu0 %v1898_v18, %s2505_s19  ;;  %s2531_s19 = smov 17  }
 0x142   : > { %924 = vrot.lane.b32.xlu1 %v1939_v32, %s1645_s22  ;;  %1154 = vperm.xlu0 %1551, %v1145_v29  }
 0x146   : > { %981 = vrot.lane.b32.xlu1 %v1939_v32, %s1648_s26  ;;  %1159 = vperm.xlu0 %1551, %v1146_v43   ;;  %v842_v43 = vsub.s32 3, %v1859_v42 }
 0x148   : > { %v2102_v27 = vrot.slane %v1869_v51, %v842_v43 }
 0x14a   : > { %1038 = vrot.lane.b32.xlu1 %v1939_v32, %s1649_s27  ;;  %1040 = vrot.lane.b32.xlu0 %v1900_v19, %s1649_s27 }
 0x14e   : > { %649 = vrot.lane.b32.xlu1 %v1898_v18, %s2531_s19  ;;  %1178 = vperm.xlu0 %1551, %v1169_v46  }
 0x152   : > { %1173 = vperm.xlu1 %1552, %v1168_v48  }
 0x156   : > { %768 = vrot.lane.b32.xlu1 %v1898_v18, %s1644_s18 }
 0x15a   : > { %825 = vrot.lane.b32.xlu1 %v1898_v18, %s1646_s25 }
 0x15e   : > { %920 = vrot.lane.b32.xlu1 %v1898_v18, %s1645_s22 }
 0x162   : > { %977 = vrot.lane.b32.xlu1 %v1898_v18, %s1648_s26 }
 0x166   : > { %1034 = vrot.lane.b32.xlu1 %v1898_v18, %s1649_s27 }
 0x16a   : > { %1091 = vrot.lane.b32.xlu1 %v1898_v18, %s2535_s16  ;;  %v2047_v18 = vand.u32 127, %v657_v39  ;;  %v2065_v39 = vrot.slane %v1869_v51, %v2050_v20 }
 0x16c   : > { %vm659_vm2 = vcmp.lt.s32.totalorder %v2047_v18, 17  ;;  %vm719_vm3 = vcmp.lt.s32.totalorder %v2047_v18, 16  ;;  %vm776_vm4 = vcmp.lt.s32.totalorder %v2047_v18, 15  ;;  %vm833_vm5 = vcmp.lt.s32.totalorder %v2047_v18, 1 }
 0x16d   : > { %vm928_vm6 = vcmp.lt.s32.totalorder %v2047_v18, 127  ;;  %vm1099_vm7 = vcmp.lt.s32.totalorder %v2047_v18, 111  ;;  %vm985_vm8 = vcmp.lt.s32.totalorder %v2047_v18, 113  ;;  %vm1042_vm9 = vcmp.lt.s32.totalorder %v2047_v18, 112 }
 0x16e   : > { %655 = vrot.lane.b32.xlu1 %v1900_v19, %s2531_s19  ;;  %s487_s19 = sand.u32 1, %s1623_s21  }
 0x172   : > { %717 = vrot.lane.b32.xlu1 %v1900_v19, %s2537_s17 }
 0x176   : > { %774 = vrot.lane.b32.xlu1 %v1900_v19, %s1644_s18  ;;  %s1454_s18 = sshll.u32 %s487_s19, 3 }
 0x178   : > { %v708_v2 = vpop.permute.xlu0 %707  ;;  %v646_v3 = vpop.permute.xlu1 %645 }
 0x17a   : > { %831 = vrot.lane.b32.xlu1 %v1900_v19, %s1646_s25  ;;  %s489_s25 = scalar_lea.vmem [#allocation3], %s1454_s18 }
 0x17c   : > { %v765_v4 = vpop.permute.xlu0 %764  ;;  %v2024_v5 = vpop.permute.xlu1 %916 }
 0x17e   : > { %926 = vrot.lane.b32.xlu1 %v1900_v19, %s1645_s22  ;;  %s1475_s22 = sshll.u32 %s1755_s9, 7  ;;  %s1650_s9 = smov [#allocation3]  }
 0x17f   : > { %s2439_s28 = scalar_lea.hbm %s2496_s15, %s1475_s22  ;;  %s1573_s17 = sshll.u32 %s1650_s9, 4  ;;  %s1574_s17 = int_to_ptr.vmem [resolvable:$false] %s1573_s17 }
 0x180   : > { %v822_v6 = vpop.permute.xlu0 %821  ;;  %v2028_v8 = vpop.permute.xlu1 %1087  ;;  %s1575_s18 = scalar_lea.vmem %s1574_s17, 256 }
 0x182   : > { %983 = vrot.lane.b32.xlu1 %v1900_v19, %s1648_s26  ;;  %s1391_s26 = sshll.u32 %s489_s25, 4  ;;  %s2441_s26 = int_to_ptr.vmem [resolvable:$true] %s1391_s26 }
 0x183   : > { %p1576_p0 = scmp.lt.s32.totalorder %s2441_s26, %s1574_s17 }
 0x184   : > { %v2032_v9 = vpop.permute.xlu0 %973  ;;  %v2034_v11 = vpop.permute.xlu1 %1093 }
 0x186   : > { %1097 = vrot.lane.b32.xlu1 %v1900_v19, %s2535_s16  ;;  %v2057_v19 = vrot.slane %v1869_v51, %v728_v17  ;;  %s1377_s16 = scalar_lea.sflag [#allocation4], %s487_s19 }
 0x188   : > { %v2041_v15 = vpop.permute.xlu0 %1030  ;;  %v2043_v16 = vpop.permute.xlu1 %647 }
 0x18a   : > { %1183 = vperm.xlu1 %1552, %v1170_v12  }
 0x18c   : > { %v652_v21 = vpop.permute.xlu0 %651  ;;  %v2052_v22 = vpop.permute.xlu1 %709 }
 0x18d   : > { %v660_v46 = vsel %vm659_vm2, %v646_v3, %v652_v21  ;;  %v663_v48 = vsel %vm659_vm2, %v652_v21, %v646_v3 }
 0x18e   : > { %v674_v3 = vmul.f32 %v2065_v39, %v663_v48  ;;  %v675_v21 = vmul.f32 %v2069_v28, %v660_v46 }
 0x190   : > { %v714_v30 = vpop.permute.xlu0 %713  ;;  %v2071_v29 = vpop.permute.xlu1 %766 }
 0x191   : > { %v720_v12 = vsel %vm719_vm3, %v708_v2, %v714_v30  ;;  %v723_v17 = vsel %vm719_vm3, %v714_v30, %v708_v2 }
 0x192   : > { %v734_v7 = vmul.f32 %v2057_v19, %v723_v17  ;;  %v735_v20 = vmul.f32 %v2060_v23, %v720_v12  ;;  %v2105_v12 = vrot.slane %v1874_v54, %v842_v43 }
 0x194   : > { %v771_v45 = vpop.permute.xlu0 %770  ;;  %v2094_v25 = vpop.permute.xlu1 %823  ;;  %v752_v48 = vmul.f32 %v1842_v33, %v734_v7  ;;  %v753_v46 = vmul.f32 %v1842_v33, %v735_v20  ;;  %v2124_v20 = vrot.slane %v1874_v54, %v937_v49 }
 0x195   : > { %v777_v2 = vsel %vm776_vm4, %v765_v4, %v771_v45  ;;  %v780_v30 = vsel %vm776_vm4, %v771_v45, %v765_v4  ;;  %v695_v45 = vmul.f32 %v683_v1, %v674_v3  ;;  %v696_v4 = vmul.f32 %v683_v1, %v675_v21 }
 0x196   : > { %v791_v17 = vmul.f32 %v2086_v63, %v780_v30  ;;  %v792_v24 = vmul.f32 %v2089_v56, %v777_v2  ;;  %v994_v2 = vsub.s32 6, %v1859_v42 }
 0x197   : > { %v758_v3 = vadd.f32 %v752_v48, %v695_v45  ;;  %v759_v1 = vadd.f32 %v753_v46, %v696_v4 }
 0x198   : > { %v809_v40 = vmul.f32 %v1856_v41, %v791_v17  ;;  %v810_v43 = vmul.f32 %v1856_v41, %v792_v24  ;;  %v828_v38 = vpop.permute.xlu0 %827  ;;  %v2117_v35 = vpop.permute.xlu1 %918  ;;  %v1051_v24 = vsub.s32 7, %v1859_v42  ;;  %v2143_v45 = vrot.slane %v1869_v51, %v994_v2 }
 0x199   : > { %v834_v7 = vsel %vm833_vm5, %v822_v6, %v828_v38  ;;  %v837_v33 = vsel %vm833_vm5, %v828_v38, %v822_v6 }
 0x19a   : > { %v848_v21 = vmul.f32 %v2102_v27, %v837_v33  ;;  %v849_v41 = vmul.f32 %v2105_v12, %v834_v7  ;;  %v815_v30 = vadd.f32 %v809_v40, %v758_v3  ;;  %v816_v17 = vadd.f32 %v810_v43, %v759_v1 }
 0x19b   : > { %v2146_v40 = vrot.slane %v1874_v54, %v994_v2  ;;  %v2152_v7 = vrot.slane %v1869_v51, %v1051_v24  ;;  %v2155_v33 = vrot.slane %v1874_v54, %v1051_v24  ;;  %v1100_v51 = vsel %vm1099_vm7, %v2028_v8, %v2034_v11  ;;  %v2185_v24 = vld [vmem:[%s2482_s1 + $0x18] ss:$0 sm:$0xff] }
 0x19c   : > { %v866_v38 = vmul.f32 %v1864_v50, %v848_v21  ;;  %v867_v49 = vmul.f32 %v1864_v50, %v849_v41  ;;  %v923_v6 = vpop.permute.xlu0 %922  ;;  %v2134_v61 = vpop.permute.xlu1 %975  ;;  %v1103_v54 = vsel %vm1099_vm7, %v2034_v11, %v2028_v8 }
 0x19d   : > { %v929_v48 = vsel %vm928_vm6, %v2024_v5, %v923_v6  ;;  %v932_v46 = vsel %vm928_vm6, %v923_v6, %v2024_v5 }
 0x19e   : > { %v872_v42 = vadd.f32 %v866_v38, %v815_v30  ;;  %v873_v4 = vadd.f32 %v867_v49, %v816_v17  ;;  %v943_v50 = vmul.f32 %v2113_v59, %v929_v48  ;;  %v944_v43 = vmul.f32 %v2124_v20, %v932_v46 }
 0x19f   : > { %v1115_v46 = vmul.f32 %v2185_v24, %v1103_v54 }
 0x1a0   : > { %v910_v5 = vadd.f32 %v1889_v10, %v872_v42  ;;  %v911_v3 = vadd.f32 %v1891_v13, %v873_v4  ;;  %v961_v2 = vmul.f32 %v1990_v52, %v943_v50  ;;  %v962_v1 = vmul.f32 %v1990_v52, %v944_v43  ;;  %v980_v21 = vpop.permute.xlu0 %979  ;;  %v2161_v41 = vpop.permute.xlu1 %1032  ;;  %v2180_v52 = vld [vmem:[%s2482_s1 + $0x10] ss:$0 sm:$0xff] }
 0x1a1   : > { %v986_v10 = vsel %vm985_vm8, %v2032_v9, %v980_v21  ;;  %v989_v13 = vsel %vm985_vm8, %v980_v21, %v2032_v9  ;;  %v1114_v48 = vmul.f32 %v2180_v52, %v1100_v51  ;;  %v1133_v51 = vmul.f32 %v2010_v62, %v1115_v46 }
 0x1a2   : > { %v967_v30 = vadd.f32 %v961_v2, %v910_v5  ;;  %v968_v8 = vadd.f32 %v962_v1, %v911_v3  ;;  %v1000_v11 = vmul.f32 %v2143_v45, %v986_v10  ;;  %v1001_v17 = vmul.f32 %v2146_v40, %v989_v13 }
 0x1a3   : > { %v1132_v21 = vmul.f32 %v2010_v62, %v1114_v48 }
 0x1a4   : > { %v1018_v38 = vmul.f32 %v1996_v55, %v1000_v11  ;;  %v1019_v9 = vmul.f32 %v1996_v55, %v1001_v17  ;;  %v1037_v49 = vpop.permute.xlu0 %1036  ;;  %v654_v6 = vpop.permute.xlu1 %653 }
 0x1a5   : > { %v1043_v42 = vsel %vm1042_vm9, %v2041_v15, %v1037_v49  ;;  %v1046_v4 = vsel %vm1042_vm9, %v1037_v49, %v2041_v15 }
 0x1a6   : > { %v1057_v50 = vmul.f32 %v2152_v7, %v1043_v42  ;;  %v1058_v43 = vmul.f32 %v2155_v33, %v1046_v4  ;;  %v1024_v5 = vadd.f32 %v1018_v38, %v967_v30  ;;  %v1025_v55 = vadd.f32 %v1019_v9, %v968_v8 }
 0x1a7   : > { %v661_v30 = vsel %vm659_vm2, %v2043_v16, %v654_v6 }
 0x1a8   : > { %v1075_v3 = vmul.f32 %v2004_v58, %v1057_v50  ;;  %v1076_v2 = vmul.f32 %v2004_v58, %v1058_v43  ;;  %v716_v1 = vpop.permute.xlu1 %715  ;;  %v664_v58 = vsel %vm659_vm2, %v654_v6, %v2043_v16 }
 0x1a9   : > { %v721_v54 = vsel %vm719_vm3, %v2052_v22, %v716_v1  ;;  %v724_v15 = vsel %vm719_vm3, %v716_v1, %v2052_v22  ;;  %v676_v9 = vmul.f32 %v2065_v39, %v664_v58  ;;  %v677_v22 = vmul.f32 %v2069_v28, %v661_v30 }
 0x1aa   : > { %v1081_v10 = vadd.f32 %v1075_v3, %v1024_v5  ;;  %v1082_v13 = vadd.f32 %v1076_v2, %v1025_v55  ;;  %v736_v62 = vmul.f32 %v2057_v19, %v724_v15  ;;  %v737_v8 = vmul.f32 %v2060_v23, %v721_v54 }
 0x1ab   : > { %v697_v5 = vmul.f32 %v1844_v34, %v676_v9  ;;  %v698_v55 = vmul.f32 %v1844_v34, %v677_v22  ;;  %v889_v30 = vmul.f32 %v1882_v60, %v1939_v32 }
 0x1ac   : > { %v773_v11 = vpop.permute.xlu1 %772  ;;  %v1138_v17 = vadd.f32 %v1132_v21, %v1081_v10  ;;  %v1139_v38 = vadd.f32 %v1133_v51, %v1082_v13  ;;  %v754_v4 = vmul.f32 %v1848_v36, %v736_v62  ;;  %v755_v50 = vmul.f32 %v1848_v36, %v737_v8 }
 0x1ad   : > { %v778_v49 = vsel %vm776_vm4, %v2071_v29, %v773_v11  ;;  %v781_v48 = vsel %vm776_vm4, %v773_v11, %v2071_v29  ;;  %v1090_v29 = vpop.permute.xlu0 %1089 }
 0x1ae   : > { %v793_v16 = vmul.f32 %v2086_v63, %v781_v48  ;;  %v794_v6 = vmul.f32 %v2089_v56, %v778_v49  ;;  %v2230_v46 = vmul.f32 %v2018_v0, %v1138_v17  ;;  %v2233_v42 = vmul.f32 %v2018_v0, %v1139_v38 }
 0x1af   : > { %v760_v51 = vadd.f32 %v754_v4, %v697_v5  ;;  %v761_v54 = vadd.f32 %v755_v50, %v698_v55 }
 0x1b0   : > { %v830_v43 = vpop.permute.xlu1 %829  ;;  %v811_v0 = vmul.f32 %v1850_v37, %v793_v16  ;;  %v812_v1 = vmul.f32 %v1850_v37, %v794_v6  ;;  %v888_v37 = vmul.f32 %v1877_v57, %v1914_v26  ;;  %v907_v26 = vmul.f32 %v1893_v14, %v889_v30 }
 0x1b1   : > { %v835_v3 = vsel %vm833_vm5, %v2094_v25, %v830_v43  ;;  %v838_v2 = vsel %vm833_vm5, %v830_v43, %v2094_v25  ;;  %v1096_v8 = vpop.permute.xlu0 %1095 }
 0x1b2   : > { %v850_v36 = vmul.f32 %v2102_v27, %v838_v2  ;;  %v851_v21 = vmul.f32 %v2105_v12, %v835_v3  ;;  %v817_v58 = vadd.f32 %v811_v0, %v760_v51  ;;  %v818_v62 = vadd.f32 %v812_v1, %v761_v54 }
 0x1b3   : > { %v906_v60 = vmul.f32 %v1893_v14, %v888_v37  ;;  %v1104_v2 = vsel %vm1099_vm7, %v1096_v8, %v1090_v29 }
 0x1b4   : > { %v868_v34 = vmul.f32 %v1861_v44, %v850_v36  ;;  %v869_v15 = vmul.f32 %v1861_v44, %v851_v21  ;;  %v925_v10 = vpop.permute.xlu1 %924 }
 0x1b5   : > { %v930_v13 = vsel %vm928_vm6, %v2117_v35, %v925_v10  ;;  %v933_v25 = vsel %vm928_vm6, %v925_v10, %v2117_v35  ;;  %v712_v50 = vpop.permute.xlu0 %711 }
 0x1b6   : > { %v874_v11 = vadd.f32 %v868_v34, %v817_v58  ;;  %v875_v44 = vadd.f32 %v869_v15, %v818_v62  ;;  %v945_v17 = vmul.f32 %v2113_v59, %v930_v13  ;;  %v946_v38 = vmul.f32 %v2124_v20, %v933_v25  ;;  %v2539_v25 = vld [vmem:[#allocation20_spill] sm:$0xff] }
 0x1b8   : > { %v982_v9 = vpop.permute.xlu1 %981  ;;  %v912_v49 = vadd.f32 %v906_v60, %v874_v11  ;;  %v913_v48 = vadd.f32 %v907_v26, %v875_v44  ;;  %v963_v16 = vmul.f32 %v1961_v31, %v945_v17  ;;  %v964_v6 = vmul.f32 %v1961_v31, %v946_v38 }
 0x1b9   : > { %v987_v35 = vsel %vm985_vm8, %v2134_v61, %v982_v9  ;;  %v990_v57 = vsel %vm985_vm8, %v982_v9, %v2134_v61  ;;  %v1101_v31 = vsel %vm1099_vm7, %v1090_v29, %v1096_v8 }
 0x1ba   : > { %v1002_v32 = vmul.f32 %v2143_v45, %v987_v35  ;;  %v1003_v22 = vmul.f32 %v2146_v40, %v990_v57  ;;  %v969_v0 = vadd.f32 %v963_v16, %v912_v49  ;;  %v970_v1 = vadd.f32 %v964_v6, %v913_v48 }
 0x1bb   : > { %v1116_v51 = vmul.f32 %v2180_v52, %v1101_v31 }
 0x1bc   : > { %v1039_v4 = vpop.permute.xlu1 %1038  ;;  %v1020_v43 = vmul.f32 %v1979_v47, %v1002_v32  ;;  %v1021_v5 = vmul.f32 %v1979_v47, %v1003_v22  ;;  %v1117_v47 = vmul.f32 %v2185_v24, %v1104_v2 }
 0x1bd   : > { %v1044_v61 = vsel %vm1042_vm9, %v2161_v41, %v1039_v4  ;;  %v1047_v14 = vsel %vm1042_vm9, %v1039_v4, %v2161_v41  ;;  %v1134_v37 = vmul.f32 %v2539_v25, %v1116_v51 }
 0x1be   : > { %v1059_v55 = vmul.f32 %v2152_v7, %v1044_v61  ;;  %v1060_v3 = vmul.f32 %v2155_v33, %v1047_v14  ;;  %v1026_v54 = vadd.f32 %v1020_v43, %v969_v0  ;;  %v1027_v34 = vadd.f32 %v1021_v5, %v970_v1 }
 0x1bf   : > { %v1135_v29 = vmul.f32 %v2539_v25, %v1117_v47 }
 0x1c0   : > { %v1077_v36 = vmul.f32 %v1992_v53, %v1059_v55  ;;  %v1078_v41 = vmul.f32 %v1992_v53, %v1060_v3  ;;  %v650_v11 = vpop.permute.xlu1 %649 }
 0x1c1   : > { %v1155_v21 = vpop.permute.xlu0 %1154 }
 0x1c2   : > { %v1083_v15 = vadd.f32 %v1077_v36, %v1026_v54  ;;  %v1084_v10 = vadd.f32 %v1078_v41, %v1027_v34 }
 0x1c4   : > { %v1140_v30 = vadd.f32 %v1134_v37, %v1083_v15  ;;  %v1141_v58 = vadd.f32 %v1135_v29, %v1084_v10  ;;  %v2540_v10 = vld [vmem:[#allocation11_spill] sm:$0xff] }
 0x1c5   : > { %v2293_v13 = vpop.permute.xlu0 %1159 }
 0x1c6   : > { %v1164_v53 = vmul.f32 %v1155_v21, %v1140_v30  ;;  %v1165_v8 = vmul.f32 %v1155_v21, %v1141_v58 }
 0x1c9   : > { %v2297_v62 = vpop.permute.xlu0 %1040 }
 0x1cd   : > { %v1179_v44 = vpop.permute.xlu0 %1178 }
 0x1ce   : > { %v1188_v17 = vadd.f32 %v1179_v44, %v1164_v53  ;;  %v1189_v38 = vadd.f32 %v1179_v44, %v1165_v8 }
 0x1d0   : > { %v1194_v9 = vmax.f32 %v1188_v17, 0.0  ;;  %v1195_v35 = vmax.f32 %v1189_v38, 0.0 }
 0x1d1   : > { %v1174_v57 = vpop.permute.xlu1 %1173 }
 0x1d2   : > { %v2299_v60 = vmin.f32 %v1194_v9, 6.0  ;;  %v2301_v26 = vmin.f32 %v1195_v35, 6.0  ;;  %v1186_v32 = vadd.f32 %v1174_v57, %v2230_v46  ;;  %v1187_v22 = vadd.f32 %v1174_v57, %v2233_v42  ;;  %v2543_v35 = vld [vmem:[#allocation14_spill] sm:$0xff] }
 0x1d4   : > { %v1192_v49 = vmax.f32 %v1186_v32, 0.0  ;;  %v1193_v48 = vmax.f32 %v1187_v22, 0.0  ;;  %v1207_v16 = vadd.f32 %v2301_v26, %v2299_v60 }
 0x1d5   : > { %v769_v6 = vpop.permute.xlu1 %768 }
 0x1d6   : > { %v2307_v4 = vmin.f32 %v1192_v49, 6.0  ;;  %v2309_v61 = vmin.f32 %v1193_v48, 6.0  ;;  %1208 = vadd.xlane.f32.xlu1 %v1207_v16 }
 0x1d8   : > { %v1204_v14 = vadd.f32 %v2309_v61, %v2307_v4 }
 0x1d9   : > { %v826_v43 = vpop.permute.xlu1 %825 }
 0x1da   : > { %1205 = vadd.xlane.f32.xlu0 %v1204_v14 }
 0x1dd   : > { %v921_v5 = vpop.permute.xlu1 %920 }
 0x1e1   : > { %v978_v46 = vpop.permute.xlu1 %977 }
 0x1e5   : > { %v1035_v55 = vpop.permute.xlu1 %1034 }
 0x1e6   : > { %v1045_v49 = vsel %vm1042_vm9, %v1035_v55, %v2297_v62  ;;  %v1048_v48 = vsel %vm1042_vm9, %v2297_v62, %v1035_v55 }
 0x1e9   : > { %v1092_v42 = vpop.permute.xlu1 %1091 }
 0x1ed   : > { %v656_v3 = vpop.permute.xlu1 %655 }
 0x1ee   : > { %v662_v2 = vsel %vm659_vm2, %v650_v11, %v656_v3  ;;  %v665_v0 = vsel %vm659_vm2, %v656_v3, %v650_v11  ;;  %v2544_v3 = vld [vmem:[#allocation15_spill] sm:$0xff] }
 0x1ef   : > { %v678_v51 = vmul.f32 %v2065_v39, %v665_v0  ;;  %v679_v47 = vmul.f32 %v2069_v28, %v662_v2  ;;  %v2542_v28 = vld [vmem:[#allocation13_spill] sm:$0xff]  ;;  %v2545_v2 = vld [vmem:[#allocation16_spill] sm:$0xff] }
 0x1f1   : > { %v718_v31 = vpop.permute.xlu1 %717 }
 0x1f2   : > { %v722_v1 = vsel %vm719_vm3, %v712_v50, %v718_v31  ;;  %v725_v36 = vsel %vm719_vm3, %v718_v31, %v712_v50 }
 0x1f3   : > { %v738_v41 = vmul.f32 %v2057_v19, %v725_v36  ;;  %v739_v21 = vmul.f32 %v2060_v23, %v722_v1  ;;  %v2541_v23 = vld [vmem:[#allocation12_spill] sm:$0xff]  ;;  %v2546_v1 = vld [vmem:[#allocation17_spill] sm:$0xff] }
 0x1f4   : > { %v699_v29 = vmul.f32 %v2541_v23, %v678_v51  ;;  %v700_v39 = vmul.f32 %v2541_v23, %v679_v47 }
 0x1f5   : > { %v775_v54 = vpop.permute.xlu1 %774  ;;  %v756_v25 = vmul.f32 %v2540_v10, %v738_v41  ;;  %v757_v37 = vmul.f32 %v2540_v10, %v739_v21  ;;  %v1061_v41 = vmul.f32 %v2152_v7, %v1045_v49  ;;  %v1062_v21 = vmul.f32 %v2155_v33, %v1048_v48  ;;  %v2548_v7 = vld [vmem:[#allocation19_spill] sm:$0xff] }
 0x1f6   : > { %v779_v34 = vsel %vm776_vm4, %v769_v6, %v775_v54  ;;  %v782_v15 = vsel %vm776_vm4, %v775_v54, %v769_v6 }
 0x1f7   : > { %v795_v50 = vmul.f32 %v2086_v63, %v782_v15  ;;  %v796_v19 = vmul.f32 %v2089_v56, %v779_v34  ;;  %v762_v44 = vadd.f32 %v756_v25, %v699_v29  ;;  %v763_v17 = vadd.f32 %v757_v37, %v700_v39  ;;  %v2547_v34 = vld [vmem:[#allocation18_spill] sm:$0xff]  ;;  %v2549_v29 = vld [vmem:[#allocation21_spill] sm:$0xff] }
 0x1f8   : > { %v1079_v37 = vmul.f32 %v2548_v7, %v1061_v41  ;;  %v1080_v33 = vmul.f32 %v2548_v7, %v1062_v21  ;;  %v1234_v41 = vld [vmem:[#allocation2] sm:$0x1]  ;;  %v1253_v7 = vld [vmem:[%s2492_s11 + $0x10] sm:$0xff] }
 0x1f9   : > { %v813_v30 = vmul.f32 %v2542_v28, %v795_v50  ;;  %v814_v58 = vmul.f32 %v2542_v28, %v796_v19  ;;  %v832_v53 = vpop.permute.xlu1 %831 }
 0x1fa   : > { %v836_v8 = vsel %vm833_vm5, %v826_v43, %v832_v53  ;;  %v839_v11 = vsel %vm833_vm5, %v832_v53, %v826_v43 }
 0x1fb   : > { %v852_v63 = vmul.f32 %v2102_v27, %v839_v11  ;;  %v853_v56 = vmul.f32 %v2105_v12, %v836_v8  ;;  %v819_v38 = vadd.f32 %v813_v30, %v762_v44  ;;  %v820_v9 = vadd.f32 %v814_v58, %v763_v17 }
 0x1fd   : > { %v870_v57 = vmul.f32 %v2543_v35, %v852_v63  ;;  %v871_v32 = vmul.f32 %v2543_v35, %v853_v56  ;;  %v927_v22 = vpop.permute.xlu1 %926 }
 0x1fe   : > { %v931_v27 = vsel %vm928_vm6, %v921_v5, %v927_v22  ;;  %v934_v12 = vsel %vm928_vm6, %v927_v22, %v921_v5  ;;  %v1217_v22 = vld [vmem:[%s2489_s8 + $0x8] sm:$0xff] }
 0x1ff   : > { %v876_v16 = vadd.f32 %v870_v57, %v819_v38  ;;  %v877_v6 = vadd.f32 %v871_v32, %v820_v9  ;;  %v947_v14 = vmul.f32 %v2113_v59, %v931_v27  ;;  %v948_v43 = vmul.f32 %v2124_v20, %v934_v12  ;;  %v1218_v27 = vld [vmem:[%s2489_s8 + $0x10] sm:$0xff] }
 0x201   : > { %v914_v31 = vadd.f32 %v2544_v3, %v876_v16  ;;  %v915_v0 = vadd.f32 %v2545_v2, %v877_v6  ;;  %v965_v36 = vmul.f32 %v2546_v1, %v947_v14  ;;  %v966_v62 = vmul.f32 %v2546_v1, %v948_v43  ;;  %v984_v55 = vpop.permute.xlu1 %983 }
 0x202   : > { %v988_v5 = vsel %vm985_vm8, %v978_v46, %v984_v55  ;;  %v991_v59 = vsel %vm985_vm8, %v984_v55, %v978_v46 }
 0x203   : > { %v1004_v20 = vmul.f32 %v2143_v45, %v988_v5  ;;  %v1005_v51 = vmul.f32 %v2146_v40, %v991_v59  ;;  %v971_v47 = vadd.f32 %v965_v36, %v914_v31  ;;  %v972_v54 = vadd.f32 %v966_v62, %v915_v0 }
 0x205   : > { %v1022_v15 = vmul.f32 %v2547_v34, %v1004_v20  ;;  %v1023_v10 = vmul.f32 %v2547_v34, %v1005_v51  ;;  %v1098_v25 = vpop.permute.xlu1 %1097  ;;  %v1238_v51 = vld [vmem:[%s2491_s10] sm:$0xff]  ;;  %v2550_v34 = vld [vmem:[#allocation22_spill] sm:$0xff] }
 0x206   : > { %v1102_v50 = vsel %vm1099_vm7, %v1092_v42, %v1098_v25  ;;  %v1105_v46 = vsel %vm1099_vm7, %v1098_v25, %v1092_v42  ;;  %v1252_v25 = vld [vmem:[%s2492_s11 + $0x8] sm:$0xff] }
 0x207   : > { %v1028_v45 = vadd.f32 %v1022_v15, %v971_v47  ;;  %v1029_v19 = vadd.f32 %v1023_v10, %v972_v54  ;;  %v1118_v40 = vmul.f32 %v2180_v52, %v1102_v50  ;;  %v1119_v23 = vmul.f32 %v2185_v24, %v1105_v46  ;;  %v1239_v47 = vld [vmem:[%s2491_s10 + $0x8] sm:$0xff]  ;;  %v1240_v54 = vld [vmem:[%s2491_s10 + $0x10] sm:$0xff]  ;;  %v1251_v10 = vld [vmem:[%s2492_s11] sm:$0xff] }
 0x209   : > { %v1136_v39 = vmul.f32 %v2549_v29, %v1118_v40  ;;  %v1137_v28 = vmul.f32 %v2549_v29, %v1119_v23  ;;  %v1085_v30 = vadd.f32 %v1079_v37, %v1028_v45  ;;  %v1086_v58 = vadd.f32 %v1080_v33, %v1029_v19  ;;  %v1184_v18 = vpop.permute.xlu1 %1183 }
 0x20b   : > { %v1142_v53 = vadd.f32 %v1136_v39, %v1085_v30  ;;  %v1143_v8 = vadd.f32 %v1137_v28, %v1086_v58 }
 0x20d   : > { %v1166_v11 = vmul.f32 %v2293_v13, %v1142_v53  ;;  %v1167_v44 = vmul.f32 %v2293_v13, %v1143_v8  ;;  %v1216_v13 = vld [vmem:[%s2489_s8] sm:$0xff] }
 0x20f   : > { %v1190_v42 = vadd.f32 %v1184_v18, %v1166_v11  ;;  %v1191_v17 = vadd.f32 %v1184_v18, %v1167_v44  ;;  %v1353_v18 = vld [vmem:[%s2494_s13] sm:$0xf] }
 0x211   : > { %v1196_v63 = vmax.f32 %v1190_v42, 0.0  ;;  %v1197_v56 = vmax.f32 %v1191_v17, 0.0  ;;  %v1361_v17 = vld [vmem:[%s2495_s14] sm:$0xf] }
 0x213   : > { %v2383_v52 = vmin.f32 %v1196_v63, 6.0  ;;  %v2385_v24 = vmin.f32 %v1197_v56, 6.0 }
 0x215   : > { %v1210_v38 = vadd.f32 %v2385_v24, %v2383_v52 }
 0x217   : > { %1211 = vadd.xlane.f32.xlu0 %v1210_v38 }
 0x263   : > { %v1209_v35 = vpop.xlane.xlu1 %1208 }
 0x264   : > { %v1214_v32 = vmul.f32 0.00390625, %v1209_v35 }
 0x266   : > { %v1220_v48 = vmul.f32 %v1217_v22, %v1214_v32 }
 0x267   : > { %v1206_v9 = vpop.xlane.xlu0 %1205 }
 0x268   : > { %v1213_v57 = vmul.f32 0.00390625, %v1206_v9  ;;  %v1224_v14 = vsel %vm1222_vm10, %v1220_v48, 0.0 }
 0x26a   : > { %v1219_v49 = vmul.f32 %v1216_v13, %v1213_v57 }
 0x26c   : > { %v1223_v16 = vsel %vm1222_vm10, %v1219_v49, 0.0 }
 0x26d   : > { %v1225_v3 = vadd.f32 %v1224_v14, %v1223_v16 }
 0x2a4   : > { %v1212_v12 = vpop.xlane.xlu0 %1211 }
 0x2a5   : > { %v1215_v6 = vmul.f32 0.00390625, %v1212_v12 }
 0x2a7   : > { %v1221_v43 = vmul.f32 %v1218_v27, %v1215_v6 }
 0x2a9   : > { %v1226_v31 = vsel %vm1222_vm10, %v1221_v43, 0.0 }
 0x2aa   : > { %v1227_v2 = vadd.f32 %v1226_v31, %v1225_v3 }
 0x2ac   : > { %v1228_v0 = vrot.slane %v1227_v2, 4 }
 0x2ae   : > { %v1229_v1 = vadd.f32 %v1228_v0, %v1227_v2  ;;  %v1568_v2 = vld [vmem:[%s1803_s30] sm:$0xff]  ;;  %s1569_s30 = scalar_lea.vmem %s2441_s26, 128 }
 0x2af   : > { %p1570_p11 = scmp.ne.s32.totalorder %s2441_s26, %s1569_s30  ;;  %p1577_p1 = scmp.lt.s32.totalorder %s1575_s18, %s1569_s30 }
 0x2b0   : > { %v1230_v36 = vrot.slane %v1229_v1, 2 }
 0x2b1   : > { %p1571_p12 = pnand %p1570_p11, %p1772_p5  ;;  %p1578_p2 = por %p1577_p1, %p1576_p0 }
 0x2b2   : > { %v1231_v62 = vadd.f32 %v1230_v36, %v1229_v1  ;;  %v2551_v1 = vld [vmem:[#allocation10_spill] sm:$0xff] }
 0x2b3   : > { %p1572_p13 = pneg %p1571_p12 }
 0x2b4   : > { %v1232_v55 = vrot.slane %v1231_v62, 1 }
 0x2b5   : > { %p1579_p3 = pnand %p1578_p2, %p1572_p13 }
 0x2b6   : > { %v1233_v21 = vadd.f32 %v1232_v55, %v1231_v62 }
 0x2b8   : > { %v1235_v5 = vadd.f32 %v1234_v41, %v1233_v21 }
 0x2ba   : > { %v1236_v59 = vmax.f32 %v1235_v5, 0.0 }
 0x2bc   : > { %v1237_v20 = vmin.f32 %v1236_v59, 6.0 }
 0x2be   : > { %v1244_v15 = vrot.slane %v1237_v20, %v2550_v34 }
 0x2c0   : > { %v1245_v37 = vmul.f32 %v1244_v15, %v1238_v51  ;;  %v1246_v33 = vmul.f32 %v1244_v15, %v1239_v47  ;;  %v1247_v50 = vmul.f32 %v1244_v15, %v1240_v54 }
 0x2c2   : > { %v1254_v46 = vadd.f32 %v1251_v10, %v1245_v37  ;;  %v1255_v45 = vadd.f32 %v1252_v25, %v1246_v33  ;;  %v1256_v19 = vadd.f32 %v1253_v7, %v1247_v50 }
 0x2c4   : > { %v1464_v40 = vmul.f32 -1.442695, %v1254_v46  ;;  %v1465_v23 = vmul.f32 -1.442695, %v1255_v45  ;;  %v1466_v29 = vmul.f32 -1.442695, %v1256_v19 }
 0x2c6   : > { %1556 = vpow2.f32 %v1464_v40 }
 0x2c7   : > { %1558 = vpow2.f32 %v1465_v23 }
 0x2c8   : > { %1560 = vpow2.f32 %v1466_v29 }
 0x2d0   : > { %v1557_v39 = vpop.eup %1556 }
 0x2d1   : > { %v1559_v28 = vpop.eup %1558  ;;  %v1266_v30 = vadd.f32 1.0, %v1557_v39 }
 0x2d2   : > { %v1561_v58 = vpop.eup %1560  ;;  %v1267_v53 = vadd.f32 1.0, %v1559_v28 }
 0x2d3   : > { %1562 = vrcp.f32 %v1266_v30  ;;  %v1268_v8 = vadd.f32 1.0, %v1561_v58 }
 0x2d4   : > { %1564 = vrcp.f32 %v1267_v53 }
 0x2d5   : > { %1566 = vrcp.f32 %v1268_v8 }
 0x2dd   : > { %v1563_v11 = vpop.eup %1562 }
 0x2de   : > { %v1565_v44 = vpop.eup %1564  ;;  %1277 = vperm.xlu0 %1551, %v1563_v11  }
 0x2df   : > { %1282 = vperm.xlu1 %1552, %v1565_v44   ;;  %v1567_v42 = vpop.eup %1566 }
 0x2e2   : > { %1356 = vperm.xlu0 %1551, %v1353_v18  }
 0x2e3   : > { %1287 = vperm.xlu1 %1552, %v1567_v42  }
 0x2e7   : > { %1364 = vperm.xlu1 %1552, %v1361_v17  }
 0x35d   : > { %v1278_v63 = vpop.permute.xlu0 %1277 }
 0x35e   : > { %v1283_v56 = vpop.permute.xlu1 %1282  ;;  %v1290_v38 = vmul.f32 %v1278_v63, %v2307_v4  ;;  %v1291_v9 = vmul.f32 %v1278_v63, %v2309_v61 }
 0x35f   : > { %v1292_v35 = vmul.f32 %v1283_v56, %v2299_v60  ;;  %v1293_v57 = vmul.f32 %v1283_v56, %v2301_v26  ;;  %v1296_v60 = vld [vmem:[%s2493_s12] sm:$0x3] }
 0x361   : > { %v1298_v13 = vpack.c.bf16 %v1293_v57, %v1291_v9  ;;  %v1297_v32 = vpack.c.bf16 %v1292_v35, %v1290_v38  ;;  %v1357_v26 = vpop.permute.xlu0 %1356 }
 0x362   : > { %v1288_v22 = vpop.permute.xlu1 %1287 }
 0x363   : > { %v1294_v49 = vmul.f32 %v1288_v22, %v2383_v52  ;;  %v1295_v48 = vmul.f32 %v1288_v22, %v2385_v24  ;;  %1312 = vmatprep.subr.bf16.mxu1 %v1298_v13 }
 0x364   : > { %1313 = vmatpush1.bf16.msra.mxu1 %v1297_v32 }
 0x365   : > { %v1299_v27 = vpack.c.bf16 %v1294_v49, %v1294_v49  ;;  %v1300_v12 = vpack.c.bf16 %v1295_v48, %v1295_v48 }
 0x366   : > { %v1365_v16 = vpop.permute.xlu1 %1364 }
 0x367   : > { %1467 = vmatprep.subr.msk.bf16.mxu1 %vm1305_vm11, %v1300_v12  ;;  %v1307_v4 = vsel %vm1305_vm11, %v1299_v27, 0 }
 0x368   : > { %1315 = vmatpush1.bf16.msra.mxu1 %v1307_v4 }
 0x36b   : > { %1468 = vmatmul.mubr.msk.bf16.vlgmr.msra.gmra.mrb[0].mxu1 %vm1301_vm12, %v1296_v60 }
 0x43e   : > { %v1346_v61 = vpop.f32.mrb[0].mxu1 }
 0x43f   : > { %v1359_v52 = vmul.f32 %v1357_v26, %v1346_v61  ;;  %v1348_v24 = vpop.f32.mrb[1].mxu1 }
 0x440   : > { %v1360_v6 = vmul.f32 %v1357_v26, %v1348_v24  ;;  %v1350_v14 = vpop.f32.mrb[2].mxu1 }
 0x441   : > { %v1367_v43 = vadd.f32 %v1365_v16, %v1359_v52  ;;  %v1351_v3 = vpop.f32.mrb[3].mxu1 }
 0x442   : > { %v1368_v31 = vadd.f32 %v1365_v16, %v1360_v6 }
 0x443   : > { %v1369_v0 = vadd.f32 %v1568_v2, %v1367_v43 }
 0x444   : > { %v1370_v36 = vadd.f32 %v1368_v31, %v2551_v1 }
 0x446   : > { %v1373_v62 = vcombine.low %v1369_v0, %v1370_v36 }
 0x448   : > { %1375 = vst [vmem:[%s489_s25] sm:$0xff] %v1373_v62 }
 0x449   : > { %1582 = shalt.err (!%p1579_p3)
}
 0x44a   : > { %s1583_s19 = scalar_lea.hbm %s2439_s28, 128  ;;  %s1587_s27 = scalar_lea.hbm %s2496_s15, 256 }
 0x44b   : > { %p1584_p4 = scmp.ne.s32.totalorder %s2439_s28, %s1583_s19  ;;  %p1588_p9 = scmp.lt.u32.totalorder %s2439_s28, %s2496_s15 }
 0x44c   : > { %p1589_p10 = scmp.lt.u32.totalorder %s1587_s27, %s1583_s19  ;;  %p1591_p12 = scmp.lt.u32.totalorder %s1583_s19, %s2439_s28 }
 0x44d   : > { %p1585_p7 = pnand %p1584_p4, %p1772_p5 }
 0x44e   : > { %p1590_p11 = por %p1589_p10, %p1588_p9 }
 0x44f   : > { %p1586_p8 = pneg %p1585_p7 }
 0x450   : > { %p1592_p13 = por %p1591_p12, %p1590_p11 }
 0x452   : > { %p1593_p0 = pnand %p1592_p13, %p1586_p8 }
 0x454   : > { %1596 = shalt.err (!%p1593_p0)
}
 0x455   : > { %1476 = dma.vmem_to_hbm [thread:$0]  (%p1772_p5), %s2441_s26, 128, %s2439_s28, %s1377_s16  }
 0x456 PF: > { %p1482_p1 = scmp.ge.s32.totalorder %s1631_s23, 2  ;;  %s1403_s17 = sand.u32 1, %s1619_s20  }
 0x457   : > { %s1404_s18 = scalar_lea.sflag [#allocation4], %s1403_s17 }
 0x458   : > { %p1479_p2 = pnand %p1482_p1, %p1776_p6 }
 0x45a   : > { %1614 = dma.done.wait (!%p1479_p2), %s1404_s18, 128  }
 0x45b   : > { %1616 = vsyncadd (!%p1479_p2), %s1404_s18, 4294967168  ;;  %s2553_s23 = sld [smem:[#allocation7_spill]]  ;;  %s2554_s19 = sld [smem:[#allocation6_spill]] }
 0x45c   : > { %s2555_s22 = sld [smem:[#allocation8_spill]]  ;;  %s2556_s20 = smov %s1623_s21 }
 0x461   : > { %p27_p3 = scmp.ge.s32.totalorder %s2553_s23, 4   ;;  %s2557_s21 = smov %s2554_s19 }
 0x463   :  { %29 = sbr.rel (!%p27_p3) target bundleno = 6 (0x6), region = 115 }
 0x46a   :  { %1409 = vsyncpa [#allocation4], 1 }
 0x46b   :  { %1411 = vsyncpa [#allocation4 + $0x1], 1 }

</bundles_post_ra>
